<compile_context>
chip_gen: v6e
topology: v6e:2x2x1
jax: 0.10.0
libtpu: 0.0.40
codegen_flags: <defaults>
</compile_context>

<pallas_src>
import jax
import jax.numpy as jnp
from jax import lax
from jax.experimental import pallas as pl
from jax.experimental.pallas import tpu as pltpu


# ----------------------------------------------------------------------------
# Fused kernel: layer-0 input projection (one big MXU matmul), wavefront-fused
# 2-layer recurrence (one packed MXU matmul + single-sigmoid gates per step),
# final linear.  Everything VMEM-resident for the current batch tile.
# x_ref is time-major within the tile: row t*BT + b  <->  (t, b).
# ----------------------------------------------------------------------------
def fused_lstm_classifier_kernel(x_ref, wih0_ref, b0_ref, wpack_ref, b1_ref,
                                 wlin_ref, blin_ref, out_ref, pre_ref):
    BT = out_ref.shape[0]              # batch-tile rows (8 = f32 sublane count)
    H = x_ref.shape[1]                 # hidden size (== embedding dim)
    H4 = 4 * H
    T = x_ref.shape[0] // BT           # sequence length

    # Hoisted lane mask: within each 4H gate block, lanes [2H,3H) are the cell
    # candidate (tanh), everything else is sigmoid.
    lane = lax.broadcasted_iota(jnp.int32, (BT, H4), 1)
    is_g = (lane >= 2 * H) & (lane < 3 * H)

    def cell(gates, c):
        # Single EUP pass: tanh(x) = 2*sigmoid(2x) - 1 on the candidate lanes.
        gx = jnp.where(is_g, gates + gates, gates)
        s = jax.nn.sigmoid(gx)
        vals = jnp.where(is_g, s + s - 1.0, s)
        i_g = vals[:, 0 * H:1 * H]
        f_g = vals[:, 1 * H:2 * H]
        g_g = vals[:, 2 * H:3 * H]
        o_g = vals[:, 3 * H:4 * H]
        c_new = f_g * c + i_g * g_g
        h_new = o_g * jnp.tanh(c_new)
        return h_new, c_new

    # Layer-0 input projection (+bias) for ALL timesteps in one MXU matmul,
    # stored to VMEM scratch so the recurrence reads (BT, 4H) aligned slices.
    pre_ref[...] = jnp.dot(x_ref[...], wih0_ref[...],
                           preferred_element_type=jnp.float32) + b0_ref[...]

    b1 = b1_ref[...]                                      # (1, 4H), broadcasts

    def wavefront(carry, pre_k):
        # Advance layer-0 one step and layer-1 one (lagged) step with a single
        # packed block-diagonal recurrent matmul: N = 8H fills the wide MXU.
        h0, c0, h1, c1 = carry
        rec = jnp.dot(jnp.concatenate([h0, h1], axis=1), wpack_ref[...],
                      preferred_element_type=jnp.float32)            # (BT, 8H)
        h0n, c0n = cell(pre_k + rec[:, :H4], c0)                     # layer 0, step k
        h1n, c1n = cell(b1 + rec[:, H4:], c1)                        # layer 1, step k-1
        return (h0n, c0n, h1n, c1n)

    zero = jnp.zeros((BT, H), jnp.float32)
    # Wavefront iteration 0: layer-0 step 0 only (all recurrent inputs are zero).
    h0, c0 = cell(pre_ref[0:BT, :], zero)
    carry = (h0, c0, zero, zero)

    if T <= 32:
        # Small T: full static unroll, static sublane-aligned slices.
        for k in range(1, T):
            carry = wavefront(carry, pre_ref[k * BT:(k + 1) * BT, :])
    else:
        # Large T: fori_loop bounds vreg live ranges; hint-aligned dynamic slices.
        def body(k, carry):
            pre_k = pre_ref[pl.ds(pl.multiple_of(k * BT, BT), BT), :]
            return wavefront(carry, pre_k)
        carry = lax.fori_loop(1, T, body, carry, unroll=2)
    h0, c0, h1, c1 = carry

    # Final wavefront iteration: layer-1 step T-1 only.
    rec = jnp.dot(jnp.concatenate([h0, h1], axis=1), wpack_ref[...],
                  preferred_element_type=jnp.float32)
    h1, _ = cell(b1 + rec[:, H4:], c1)

    # Final linear on the last-timestep hidden state; logits leave VMEM once.
    out_ref[...] = jnp.dot(h1, wlin_ref[...],
                           preferred_element_type=jnp.float32) + blin_ref[...]


def fused_lstm_classifier(x_tiles, wih0, b0, w_pack, b1, wlin, blin):
    nbt, TB, H = x_tiles.shape
    H4 = 4 * H
    BT = 8
    O = wlin.shape[1]

    # Explicit scoped-VMEM budget from the resident footprint (double-buffered
    # blocks + pre-projection scratch + live state), clamped to the smallest
    # physical VMEM across generations (64 MiB on v7x).
    f32 = 4
    blk = (TB * H + H * H4 + H4 + 2 * H * 2 * H4 + H4 + H * O + O + BT * O) * f32
    tmp = (TB * H4 + 12 * BT * H + 2 * BT * 2 * H4) * f32
    vmem_limit = int(min(64 * 1024 * 1024, max(32 * 1024 * 1024, 3 * blk + 2 * tmp)))

    return pl.pallas_call(
        fused_lstm_classifier_kernel,
        out_shape=jax.ShapeDtypeStruct((nbt, BT, O), jnp.float32),
        grid=(nbt,),
        in_specs=[
            pl.BlockSpec((None, TB, H), lambda i: (i, 0, 0)),   # x, one batch tile
            pl.BlockSpec((H, H4), lambda i: (0, 0)),            # W_ih^T layer 0
            pl.BlockSpec((1, H4), lambda i: (0, 0)),            # b layer 0
            pl.BlockSpec((2 * H, 2 * H4), lambda i: (0, 0)),    # packed recurrent W
            pl.BlockSpec((1, H4), lambda i: (0, 0)),            # b layer 1
            pl.BlockSpec((H, O), lambda i: (0, 0)),             # W_lin^T
            pl.BlockSpec((1, O), lambda i: (0, 0)),             # b_lin
        ],
        out_specs=pl.BlockSpec((None, BT, O), lambda i: (i, 0, 0)),
        scratch_shapes=[pltpu.VMEM((TB, H4), jnp.float32)],     # layer-0 pre-projection
        compiler_params=pltpu.CompilerParams(
            dimension_semantics=("parallel",),                  # v7x: shard batch tiles
            vmem_limit_bytes=vmem_limit),
    )(x_tiles, wih0, b0, w_pack, b1, wlin, blin)


# ----------------------------------------------------------------------------
# Full forward pass (glue in JAX: time-major embedding gather, batch pad/tiling,
# packed recurrent weight construction).
# ----------------------------------------------------------------------------
def lstm_classifier_forward(token_ids, params):
    B, T = token_ids.shape
    H = params["w_hh_l0"].shape[0]
    O = params["w_lin"].shape[1]
    BT = 8                                                # f32 sublane tile
    Bp = max(BT, ((B + BT - 1) // BT) * BT)
    nbt = Bp // BT

    # Gather directly in time-major order (no post-gather HBM transpose copy).
    x = params["embedding"][token_ids.T]                  # (T, B, H)
    if Bp != B:
        x = jnp.pad(x, ((0, 0), (0, Bp - B), (0, 0)))     # (T, Bp, H)
    # Per-batch-tile time-major flatten: tile i holds rows t*BT + b.
    x = x.reshape(T, nbt, BT, H).transpose(1, 0, 2, 3).reshape(nbt, T * BT, H)

    # Packed block-diagonal recurrent weight: [[W_hh0, W_ih1], [0, W_hh1]] (2H, 8H).
    w_pack = jnp.concatenate(
        [jnp.concatenate([params["w_hh_l0"], params["w_ih_l1"]], axis=1),
         jnp.concatenate([jnp.zeros((H, 4 * H), jnp.float32),
                          params["w_hh_l1"]], axis=1)], axis=0)

    logits = fused_lstm_classifier(
        x, params["w_ih_l0"], params["b_l0"], w_pack, params["b_l1"],
        params["w_lin"], params["b_lin"])                 # (nbt, BT, O)

    logits = logits.reshape(Bp, O)[:B]                    # drop padded rows
    return jnp.squeeze(logits)                            # matches torch .squeeze()


# ----------------------------------------------------------------------------
# Pure-JAX reference (lax.scan) for sanity checking.
# ----------------------------------------------------------------------------
def _ref_lstm_layer(x_tbh, w_ih_t, w_hh_t, bias):
    T, B, H_in = x_tbh.shape
    H = w_hh_t.shape[0]

    def step(carry, x_t):
        h, c = carry
        gates = x_t @ w_ih_t + h @ w_hh_t + bias[0]
        i = jax.nn.sigmoid(gates[:, 0 * H:1 * H])
        f = jax.nn.sigmoid(gates[:, 1 * H:2 * H])
        g = jnp.tanh(gates[:, 2 * H:3 * H])
        o = jax.nn.sigmoid(gates[:, 3 * H:4 * H])
        c = f * c + i * g
        h = o * jnp.tanh(c)
        return (h, c), h

    init = (jnp.zeros((B, H), jnp.float32), jnp.zeros((B, H), jnp.float32))
    _, hs = lax.scan(step, init, x_tbh)
    return hs


def reference_forward(token_ids, params):
    emb = params["embedding"][token_ids]
    x = jnp.transpose(emb, (1, 0, 2))
    h1 = _ref_lstm_layer(x, params["w_ih_l0"], params["w_hh_l0"], params["b_l0"])
    h2 = _ref_lstm_layer(h1, params["w_ih_l1"], params["w_hh_l1"], params["b_l1"])
    return jnp.squeeze(h2[-1] @ params["w_lin"] + params["b_lin"][0])


# ----------------------------------------------------------------------------
# Deterministic parameter init (shapes follow nn.Embedding / nn.LSTM / nn.Linear).
# ----------------------------------------------------------------------------
def init_params(key, vocab_size, hidden_size, output_size):
    H, O = hidden_size, output_size
    ks = jax.random.split(key, 12)
    s = 1.0 / jnp.sqrt(H)

    emb = jax.random.normal(ks[0], (vocab_size, H), jnp.float32) * 0.1
    emb = emb.at[0].set(0.0)  # padding_idx=0

    def u(k, shape):
        return jax.random.uniform(k, shape, jnp.float32, -s, s)

    params = {
        "embedding": emb,
        # layer 0: input size = H
        "w_ih_l0": u(ks[1], (H, 4 * H)),                         # W_ih^T
        "w_hh_l0": u(ks[2], (H, 4 * H)),                         # W_hh^T
        "b_l0": (u(ks[3], (1, 4 * H)) + u(ks[4], (1, 4 * H))),   # b_ih + b_hh
        # layer 1: input size = H
        "w_ih_l1": u(ks[5], (H, 4 * H)),
        "w_hh_l1": u(ks[6], (H, 4 * H)),
        "b_l1": (u(ks[7], (1, 4 * H)) + u(ks[8], (1, 4 * H))),
        # final linear: (O, H) in torch -> stored transposed (H, O)
        "w_lin": u(ks[9], (H, O)),
        "b_lin": u(ks[10], (1, O)),
    }
    return params


if __name__ == "__main__":
    VOCAB, HIDDEN, OUT = 50, 32, 4
    B, T = 2, 8

    key = jax.random.PRNGKey(0)
    k_tok, k_par = jax.random.split(key)
    token_ids = jax.random.randint(k_tok, (B, T), 0, VOCAB, dtype=jnp.int32)
    params = init_params(k_par, VOCAB, HIDDEN, OUT)

    fwd = jax.jit(lstm_classifier_forward)
    out = jax.block_until_ready(fwd(token_ids, params))

    ref = jax.block_until_ready(reference_forward(token_ids, params))
    assert out.shape == (B, OUT), out.shape
    assert jnp.max(jnp.abs(out - ref)) < 5e-4, "mismatch vs pure-JAX reference"

    print("KERNEL_OK")
</pallas_src>

<mosaic_0001>
module attributes {stable_mosaic.version = 11 : i64} {
  func.func @fused_lstm_classifier_kernel(%arg0: i32, %arg1: memref<1x64x32xf32, #tpu.memory_space<vmem>>, %arg2: memref<32x128xf32, #tpu.memory_space<vmem>>, %arg3: memref<1x128xf32, #tpu.memory_space<vmem>>, %arg4: memref<64x256xf32, #tpu.memory_space<vmem>>, %arg5: memref<1x128xf32, #tpu.memory_space<vmem>>, %arg6: memref<32x4xf32, #tpu.memory_space<vmem>>, %arg7: memref<1x4xf32, #tpu.memory_space<vmem>>, %arg8: memref<1x8x4xf32, #tpu.memory_space<vmem>>, %arg9: memref<64x128xf32, #tpu.memory_space<vmem>>) attributes {dimension_semantics = [#tpu.dimension_semantics<parallel>], iteration_bounds = array<i64: 1>, scalar_prefetch = 0 : i64, scratch_operands = 1 : i64, tpu.core_type = #tpu.core_type<tc>, window_params = [{transform_indices = @transform_0, window_bounds = array<i64: 1, 64, 32>}, {pipeline_mode = #tpu.pipeline_mode<synchronous>, transform_indices = @transform_1, window_bounds = array<i64: 32, 128>}, {pipeline_mode = #tpu.pipeline_mode<synchronous>, transform_indices = @transform_2, window_bounds = array<i64: 1, 128>}, {pipeline_mode = #tpu.pipeline_mode<synchronous>, transform_indices = @transform_3, window_bounds = array<i64: 64, 256>}, {pipeline_mode = #tpu.pipeline_mode<synchronous>, transform_indices = @transform_4, window_bounds = array<i64: 1, 128>}, {pipeline_mode = #tpu.pipeline_mode<synchronous>, transform_indices = @transform_5, window_bounds = array<i64: 32, 4>}, {pipeline_mode = #tpu.pipeline_mode<synchronous>, transform_indices = @transform_6, window_bounds = array<i64: 1, 4>}, {transform_indices = @transform_7, window_bounds = array<i64: 1, 8, 4>}]} {
    %0 = tpu.iota {dimensions = array<i32: 1>} : vector<8x128xi32>
    %c64_i32 = arith.constant 64 : i32
    %1 = vector.broadcast %c64_i32 : i32 to vector<8x128xi32>
    %2 = arith.cmpi sge, %0, %1 : vector<8x128xi32>
    %c96_i32 = arith.constant 96 : i32
    %3 = vector.broadcast %c96_i32 : i32 to vector<8x128xi32>
    %4 = arith.cmpi slt, %0, %3 : vector<8x128xi32>
    %5 = arith.andi %2, %4 : vector<8x128xi1>
    %c0 = arith.constant 0 : index
    %c0_0 = arith.constant 0 : index
    %c0_1 = arith.constant 0 : index
    %6 = vector.load %arg1[%c0, %c0_0, %c0_1] : memref<1x64x32xf32, #tpu.memory_space<vmem>>, vector<1x64x32xf32>
    %7 = vector.shape_cast %6 : vector<1x64x32xf32> to vector<64x32xf32>
    %c0_2 = arith.constant 0 : index
    %c0_3 = arith.constant 0 : index
    %8 = vector.load %arg2[%c0_2, %c0_3] : memref<32x128xf32, #tpu.memory_space<vmem>>, vector<32x128xf32>
    %cst = arith.constant dense<0.000000e+00> : vector<64x128xf32>
    %9 = tpu.matmul %7, %8, %cst {dimension_numbers = #tpu.dot_dimension_numbers<[1], [0], [0], [1], [0, 0, 1, 1], [], []>} : vector<64x32xf32>, vector<32x128xf32>, vector<64x128xf32> -> vector<64x128xf32>
    %c0_4 = arith.constant 0 : index
    %c0_5 = arith.constant 0 : index
    %10 = vector.load %arg3[%c0_4, %c0_5] : memref<1x128xf32, #tpu.memory_space<vmem>>, vector<1x128xf32>
    %11 = vector.broadcast %10 : vector<1x128xf32> to vector<64x128xf32>
    %12 = arith.addf %9, %11 : vector<64x128xf32>
    %c0_6 = arith.constant 0 : index
    %c0_7 = arith.constant 0 : index
    %13 = vector.load %arg9[%c0_6, %c0_7] : memref<64x128xf32, #tpu.memory_space<vmem>>, vector<64x128xf32>
    tpu.vector_store %arg9[%c0_6, %c0_7], %12 {strides = array<i32>} : memref<64x128xf32, #tpu.memory_space<vmem>>, vector<64x128xf32>,
    %c0_8 = arith.constant 0 : index
    %c0_9 = arith.constant 0 : index
    %14 = vector.load %arg5[%c0_8, %c0_9] : memref<1x128xf32, #tpu.memory_space<vmem>>, vector<1x128xf32>
    %cst_10 = arith.constant 0.000000e+00 : f32
    %15 = vector.broadcast %cst_10 : f32 to vector<8x32xf32>
    %c0_11 = arith.constant 0 : index
    %c0_12 = arith.constant 0 : index
    %16 = vector.load %arg9[%c0_11, %c0_12] : memref<64x128xf32, #tpu.memory_space<vmem>>, vector<8x128xf32>
    %17 = arith.addf %16, %16 : vector<8x128xf32>
    %18 = arith.select %5, %17, %16 : vector<8x128xi1>, vector<8x128xf32>
    %19 = arith.negf %18 : vector<8x128xf32>
    %20 = math.exp %19 : vector<8x128xf32>
    %cst_13 = arith.constant 1.000000e+00 : f32
    %21 = vector.broadcast %cst_13 : f32 to vector<8x128xf32>
    %22 = arith.addf %21, %20 : vector<8x128xf32>
    %23 = arith.divf %21, %22 : vector<8x128xf32>
    %24 = arith.addf %23, %23 : vector<8x128xf32>
    %cst_14 = arith.constant 1.000000e+00 : f32
    %25 = vector.broadcast %cst_14 : f32 to vector<8x128xf32>
    %26 = arith.subf %24, %25 : vector<8x128xf32>
    %27 = arith.select %5, %26, %23 : vector<8x128xi1>, vector<8x128xf32>
    %28 = vector.extract_strided_slice %27 {offsets = [0, 0], sizes = [8, 32], strides = [1, 1]} : vector<8x128xf32> to vector<8x32xf32>
    %29 = vector.extract_strided_slice %27 {offsets = [0, 32], sizes = [8, 32], strides = [1, 1]} : vector<8x128xf32> to vector<8x32xf32>
    %30 = vector.extract_strided_slice %27 {offsets = [0, 64], sizes = [8, 32], strides = [1, 1]} : vector<8x128xf32> to vector<8x32xf32>
    %31 = vector.extract_strided_slice %27 {offsets = [0, 96], sizes = [8, 32], strides = [1, 1]} : vector<8x128xf32> to vector<8x32xf32>
    %32 = arith.mulf %29, %15 : vector<8x32xf32>
    %33 = arith.mulf %28, %30 : vector<8x32xf32>
    %34 = arith.addf %32, %33 : vector<8x32xf32>
    %35 = math.tanh %34 : vector<8x32xf32>
    %36 = arith.mulf %31, %35 : vector<8x32xf32>
    %c8 = arith.constant 8 : index
    %c0_15 = arith.constant 0 : index
    %37 = vector.load %arg9[%c8, %c0_15] : memref<64x128xf32, #tpu.memory_space<vmem>>, vector<8x128xf32>
    %38 = tpu.concatenate %36, %15 in 1 : vector<8x32xf32>, vector<8x32xf32> -> vector<8x64xf32>
    %c0_16 = arith.constant 0 : index
    %c0_17 = arith.constant 0 : index
    %39 = vector.load %arg4[%c0_16, %c0_17] : memref<64x256xf32, #tpu.memory_space<vmem>>, vector<64x256xf32>
    %cst_18 = arith.constant dense<0.000000e+00> : vector<8x256xf32>
    %40 = tpu.matmul %38, %39, %cst_18 {dimension_numbers = #tpu.dot_dimension_numbers<[1], [0], [0], [1], [0, 0, 1, 1], [], []>} : vector<8x64xf32>, vector<64x256xf32>, vector<8x256xf32> -> vector<8x256xf32>
    %41 = vector.extract_strided_slice %40 {offsets = [0, 0], sizes = [8, 128], strides = [1, 1]} : vector<8x256xf32> to vector<8x128xf32>
    %42 = arith.addf %37, %41 : vector<8x128xf32>
    %43 = arith.addf %42, %42 : vector<8x128xf32>
    %44 = arith.select %5, %43, %42 : vector<8x128xi1>, vector<8x128xf32>
    %45 = arith.negf %44 : vector<8x128xf32>
    %46 = math.exp %45 : vector<8x128xf32>
    %cst_19 = arith.constant 1.000000e+00 : f32
    %47 = vector.broadcast %cst_19 : f32 to vector<8x128xf32>
    %48 = arith.addf %47, %46 : vector<8x128xf32>
    %49 = arith.divf %47, %48 : vector<8x128xf32>
    %50 = arith.addf %49, %49 : vector<8x128xf32>
    %cst_20 = arith.constant 1.000000e+00 : f32
    %51 = vector.broadcast %cst_20 : f32 to vector<8x128xf32>
    %52 = arith.subf %50, %51 : vector<8x128xf32>
    %53 = arith.select %5, %52, %49 : vector<8x128xi1>, vector<8x128xf32>
    %54 = vector.extract_strided_slice %53 {offsets = [0, 0], sizes = [8, 32], strides = [1, 1]} : vector<8x128xf32> to vector<8x32xf32>
    %55 = vector.extract_strided_slice %53 {offsets = [0, 32], sizes = [8, 32], strides = [1, 1]} : vector<8x128xf32> to vector<8x32xf32>
    %56 = vector.extract_strided_slice %53 {offsets = [0, 64], sizes = [8, 32], strides = [1, 1]} : vector<8x128xf32> to vector<8x32xf32>
    %57 = vector.extract_strided_slice %53 {offsets = [0, 96], sizes = [8, 32], strides = [1, 1]} : vector<8x128xf32> to vector<8x32xf32>
    %58 = arith.mulf %55, %34 : vector<8x32xf32>
    %59 = arith.mulf %54, %56 : vector<8x32xf32>
    %60 = arith.addf %58, %59 : vector<8x32xf32>
    %61 = math.tanh %60 : vector<8x32xf32>
    %62 = arith.mulf %57, %61 : vector<8x32xf32>
    %63 = vector.extract_strided_slice %40 {offsets = [0, 128], sizes = [8, 128], strides = [1, 1]} : vector<8x256xf32> to vector<8x128xf32>
    %64 = vector.broadcast %14 : vector<1x128xf32> to vector<8x128xf32>
    %65 = arith.addf %64, %63 : vector<8x128xf32>
    %66 = arith.addf %65, %65 : vector<8x128xf32>
    %67 = arith.select %5, %66, %65 : vector<8x128xi1>, vector<8x128xf32>
    %68 = arith.negf %67 : vector<8x128xf32>
    %69 = math.exp %68 : vector<8x128xf32>
    %cst_21 = arith.constant 1.000000e+00 : f32
    %70 = vector.broadcast %cst_21 : f32 to vector<8x128xf32>
    %71 = arith.addf %70, %69 : vector<8x128xf32>
    %72 = arith.divf %70, %71 : vector<8x128xf32>
    %73 = arith.addf %72, %72 : vector<8x128xf32>
    %cst_22 = arith.constant 1.000000e+00 : f32
    %74 = vector.broadcast %cst_22 : f32 to vector<8x128xf32>
    %75 = arith.subf %73, %74 : vector<8x128xf32>
    %76 = arith.select %5, %75, %72 : vector<8x128xi1>, vector<8x128xf32>
    %77 = vector.extract_strided_slice %76 {offsets = [0, 0], sizes = [8, 32], strides = [1, 1]} : vector<8x128xf32> to vector<8x32xf32>
    %78 = vector.extract_strided_slice %76 {offsets = [0, 32], sizes = [8, 32], strides = [1, 1]} : vector<8x128xf32> to vector<8x32xf32>
    %79 = vector.extract_strided_slice %76 {offsets = [0, 64], sizes = [8, 32], strides = [1, 1]} : vector<8x128xf32> to vector<8x32xf32>
    %80 = vector.extract_strided_slice %76 {offsets = [0, 96], sizes = [8, 32], strides = [1, 1]} : vector<8x128xf32> to vector<8x32xf32>
    %81 = arith.mulf %78, %15 : vector<8x32xf32>
    %82 = arith.mulf %77, %79 : vector<8x32xf32>
    %83 = arith.addf %81, %82 : vector<8x32xf32>
    %84 = math.tanh %83 : vector<8x32xf32>
    %85 = arith.mulf %80, %84 : vector<8x32xf32>
    %c16 = arith.constant 16 : index
    %c0_23 = arith.constant 0 : index
    %86 = vector.load %arg9[%c16, %c0_23] : memref<64x128xf32, #tpu.memory_space<vmem>>, vector<8x128xf32>
    %87 = tpu.concatenate %62, %85 in 1 : vector<8x32xf32>, vector<8x32xf32> -> vector<8x64xf32>
    %c0_24 = arith.constant 0 : index
    %c0_25 = arith.constant 0 : index
    %88 = vector.load %arg4[%c0_24, %c0_25] : memref<64x256xf32, #tpu.memory_space<vmem>>, vector<64x256xf32>
    %cst_26 = arith.constant dense<0.000000e+00> : vector<8x256xf32>
    %89 = tpu.matmul %87, %88, %cst_26 {dimension_numbers = #tpu.dot_dimension_numbers<[1], [0], [0], [1], [0, 0, 1, 1], [], []>} : vector<8x64xf32>, vector<64x256xf32>, vector<8x256xf32> -> vector<8x256xf32>
    %90 = vector.extract_strided_slice %89 {offsets = [0, 0], sizes = [8, 128], strides = [1, 1]} : vector<8x256xf32> to vector<8x128xf32>
    %91 = arith.addf %86, %90 : vector<8x128xf32>
    %92 = arith.addf %91, %91 : vector<8x128xf32>
    %93 = arith.select %5, %92, %91 : vector<8x128xi1>, vector<8x128xf32>
    %94 = arith.negf %93 : vector<8x128xf32>
    %95 = math.exp %94 : vector<8x128xf32>
    %cst_27 = arith.constant 1.000000e+00 : f32
    %96 = vector.broadcast %cst_27 : f32 to vector<8x128xf32>
    %97 = arith.addf %96, %95 : vector<8x128xf32>
    %98 = arith.divf %96, %97 : vector<8x128xf32>
    %99 = arith.addf %98, %98 : vector<8x128xf32>
    %cst_28 = arith.constant 1.000000e+00 : f32
    %100 = vector.broadcast %cst_28 : f32 to vector<8x128xf32>
    %101 = arith.subf %99, %100 : vector<8x128xf32>
    %102 = arith.select %5, %101, %98 : vector<8x128xi1>, vector<8x128xf32>
    %103 = vector.extract_strided_slice %102 {offsets = [0, 0], sizes = [8, 32], strides = [1, 1]} : vector<8x128xf32> to vector<8x32xf32>
    %104 = vector.extract_strided_slice %102 {offsets = [0, 32], sizes = [8, 32], strides = [1, 1]} : vector<8x128xf32> to vector<8x32xf32>
    %105 = vector.extract_strided_slice %102 {offsets = [0, 64], sizes = [8, 32], strides = [1, 1]} : vector<8x128xf32> to vector<8x32xf32>
    %106 = vector.extract_strided_slice %102 {offsets = [0, 96], sizes = [8, 32], strides = [1, 1]} : vector<8x128xf32> to vector<8x32xf32>
    %107 = arith.mulf %104, %60 : vector<8x32xf32>
    %108 = arith.mulf %103, %105 : vector<8x32xf32>
    %109 = arith.addf %107, %108 : vector<8x32xf32>
    %110 = math.tanh %109 : vector<8x32xf32>
    %111 = arith.mulf %106, %110 : vector<8x32xf32>
    %112 = vector.extract_strided_slice %89 {offsets = [0, 128], sizes = [8, 128], strides = [1, 1]} : vector<8x256xf32> to vector<8x128xf32>
    %113 = vector.broadcast %14 : vector<1x128xf32> to vector<8x128xf32>
    %114 = arith.addf %113, %112 : vector<8x128xf32>
    %115 = arith.addf %114, %114 : vector<8x128xf32>
    %116 = arith.select %5, %115, %114 : vector<8x128xi1>, vector<8x128xf32>
    %117 = arith.negf %116 : vector<8x128xf32>
    %118 = math.exp %117 : vector<8x128xf32>
    %cst_29 = arith.constant 1.000000e+00 : f32
    %119 = vector.broadcast %cst_29 : f32 to vector<8x128xf32>
    %120 = arith.addf %119, %118 : vector<8x128xf32>
    %121 = arith.divf %119, %120 : vector<8x128xf32>
    %122 = arith.addf %121, %121 : vector<8x128xf32>
    %cst_30 = arith.constant 1.000000e+00 : f32
    %123 = vector.broadcast %cst_30 : f32 to vector<8x128xf32>
    %124 = arith.subf %122, %123 : vector<8x128xf32>
    %125 = arith.select %5, %124, %121 : vector<8x128xi1>, vector<8x128xf32>
    %126 = vector.extract_strided_slice %125 {offsets = [0, 0], sizes = [8, 32], strides = [1, 1]} : vector<8x128xf32> to vector<8x32xf32>
    %127 = vector.extract_strided_slice %125 {offsets = [0, 32], sizes = [8, 32], strides = [1, 1]} : vector<8x128xf32> to vector<8x32xf32>
    %128 = vector.extract_strided_slice %125 {offsets = [0, 64], sizes = [8, 32], strides = [1, 1]} : vector<8x128xf32> to vector<8x32xf32>
    %129 = vector.extract_strided_slice %125 {offsets = [0, 96], sizes = [8, 32], strides = [1, 1]} : vector<8x128xf32> to vector<8x32xf32>
    %130 = arith.mulf %127, %83 : vector<8x32xf32>
    %131 = arith.mulf %126, %128 : vector<8x32xf32>
    %132 = arith.addf %130, %131 : vector<8x32xf32>
    %133 = math.tanh %132 : vector<8x32xf32>
    %134 = arith.mulf %129, %133 : vector<8x32xf32>
    %c24 = arith.constant 24 : index
    %c0_31 = arith.constant 0 : index
    %135 = vector.load %arg9[%c24, %c0_31] : memref<64x128xf32, #tpu.memory_space<vmem>>, vector<8x128xf32>
    %136 = tpu.concatenate %111, %134 in 1 : vector<8x32xf32>, vector<8x32xf32> -> vector<8x64xf32>
    %c0_32 = arith.constant 0 : index
    %c0_33 = arith.constant 0 : index
    %137 = vector.load %arg4[%c0_32, %c0_33] : memref<64x256xf32, #tpu.memory_space<vmem>>, vector<64x256xf32>
    %cst_34 = arith.constant dense<0.000000e+00> : vector<8x256xf32>
    %138 = tpu.matmul %136, %137, %cst_34 {dimension_numbers = #tpu.dot_dimension_numbers<[1], [0], [0], [1], [0, 0, 1, 1], [], []>} : vector<8x64xf32>, vector<64x256xf32>, vector<8x256xf32> -> vector<8x256xf32>
    %139 = vector.extract_strided_slice %138 {offsets = [0, 0], sizes = [8, 128], strides = [1, 1]} : vector<8x256xf32> to vector<8x128xf32>
    %140 = arith.addf %135, %139 : vector<8x128xf32>
    %141 = arith.addf %140, %140 : vector<8x128xf32>
    %142 = arith.select %5, %141, %140 : vector<8x128xi1>, vector<8x128xf32>
    %143 = arith.negf %142 : vector<8x128xf32>
    %144 = math.exp %143 : vector<8x128xf32>
    %cst_35 = arith.constant 1.000000e+00 : f32
    %145 = vector.broadcast %cst_35 : f32 to vector<8x128xf32>
    %146 = arith.addf %145, %144 : vector<8x128xf32>
    %147 = arith.divf %145, %146 : vector<8x128xf32>
    %148 = arith.addf %147, %147 : vector<8x128xf32>
    %cst_36 = arith.constant 1.000000e+00 : f32
    %149 = vector.broadcast %cst_36 : f32 to vector<8x128xf32>
    %150 = arith.subf %148, %149 : vector<8x128xf32>
    %151 = arith.select %5, %150, %147 : vector<8x128xi1>, vector<8x128xf32>
    %152 = vector.extract_strided_slice %151 {offsets = [0, 0], sizes = [8, 32], strides = [1, 1]} : vector<8x128xf32> to vector<8x32xf32>
    %153 = vector.extract_strided_slice %151 {offsets = [0, 32], sizes = [8, 32], strides = [1, 1]} : vector<8x128xf32> to vector<8x32xf32>
    %154 = vector.extract_strided_slice %151 {offsets = [0, 64], sizes = [8, 32], strides = [1, 1]} : vector<8x128xf32> to vector<8x32xf32>
    %155 = vector.extract_strided_slice %151 {offsets = [0, 96], sizes = [8, 32], strides = [1, 1]} : vector<8x128xf32> to vector<8x32xf32>
    %156 = arith.mulf %153, %109 : vector<8x32xf32>
    %157 = arith.mulf %152, %154 : vector<8x32xf32>
    %158 = arith.addf %156, %157 : vector<8x32xf32>
    %159 = math.tanh %158 : vector<8x32xf32>
    %160 = arith.mulf %155, %159 : vector<8x32xf32>
    %161 = vector.extract_strided_slice %138 {offsets = [0, 128], sizes = [8, 128], strides = [1, 1]} : vector<8x256xf32> to vector<8x128xf32>
    %162 = vector.broadcast %14 : vector<1x128xf32> to vector<8x128xf32>
    %163 = arith.addf %162, %161 : vector<8x128xf32>
    %164 = arith.addf %163, %163 : vector<8x128xf32>
    %165 = arith.select %5, %164, %163 : vector<8x128xi1>, vector<8x128xf32>
    %166 = arith.negf %165 : vector<8x128xf32>
    %167 = math.exp %166 : vector<8x128xf32>
    %cst_37 = arith.constant 1.000000e+00 : f32
    %168 = vector.broadcast %cst_37 : f32 to vector<8x128xf32>
    %169 = arith.addf %168, %167 : vector<8x128xf32>
    %170 = arith.divf %168, %169 : vector<8x128xf32>
    %171 = arith.addf %170, %170 : vector<8x128xf32>
    %cst_38 = arith.constant 1.000000e+00 : f32
    %172 = vector.broadcast %cst_38 : f32 to vector<8x128xf32>
    %173 = arith.subf %171, %172 : vector<8x128xf32>
    %174 = arith.select %5, %173, %170 : vector<8x128xi1>, vector<8x128xf32>
    %175 = vector.extract_strided_slice %174 {offsets = [0, 0], sizes = [8, 32], strides = [1, 1]} : vector<8x128xf32> to vector<8x32xf32>
    %176 = vector.extract_strided_slice %174 {offsets = [0, 32], sizes = [8, 32], strides = [1, 1]} : vector<8x128xf32> to vector<8x32xf32>
    %177 = vector.extract_strided_slice %174 {offsets = [0, 64], sizes = [8, 32], strides = [1, 1]} : vector<8x128xf32> to vector<8x32xf32>
    %178 = vector.extract_strided_slice %174 {offsets = [0, 96], sizes = [8, 32], strides = [1, 1]} : vector<8x128xf32> to vector<8x32xf32>
    %179 = arith.mulf %176, %132 : vector<8x32xf32>
    %180 = arith.mulf %175, %177 : vector<8x32xf32>
    %181 = arith.addf %179, %180 : vector<8x32xf32>
    %182 = math.tanh %181 : vector<8x32xf32>
    %183 = arith.mulf %178, %182 : vector<8x32xf32>
    %c32 = arith.constant 32 : index
    %c0_39 = arith.constant 0 : index
    %184 = vector.load %arg9[%c32, %c0_39] : memref<64x128xf32, #tpu.memory_space<vmem>>, vector<8x128xf32>
    %185 = tpu.concatenate %160, %183 in 1 : vector<8x32xf32>, vector<8x32xf32> -> vector<8x64xf32>
    %c0_40 = arith.constant 0 : index
    %c0_41 = arith.constant 0 : index
    %186 = vector.load %arg4[%c0_40, %c0_41] : memref<64x256xf32, #tpu.memory_space<vmem>>, vector<64x256xf32>
    %cst_42 = arith.constant dense<0.000000e+00> : vector<8x256xf32>
    %187 = tpu.matmul %185, %186, %cst_42 {dimension_numbers = #tpu.dot_dimension_numbers<[1], [0], [0], [1], [0, 0, 1, 1], [], []>} : vector<8x64xf32>, vector<64x256xf32>, vector<8x256xf32> -> vector<8x256xf32>
    %188 = vector.extract_strided_slice %187 {offsets = [0, 0], sizes = [8, 128], strides = [1, 1]} : vector<8x256xf32> to vector<8x128xf32>
    %189 = arith.addf %184, %188 : vector<8x128xf32>
    %190 = arith.addf %189, %189 : vector<8x128xf32>
    %191 = arith.select %5, %190, %189 : vector<8x128xi1>, vector<8x128xf32>
    %192 = arith.negf %191 : vector<8x128xf32>
    %193 = math.exp %192 : vector<8x128xf32>
    %cst_43 = arith.constant 1.000000e+00 : f32
    %194 = vector.broadcast %cst_43 : f32 to vector<8x128xf32>
    %195 = arith.addf %194, %193 : vector<8x128xf32>
    %196 = arith.divf %194, %195 : vector<8x128xf32>
    %197 = arith.addf %196, %196 : vector<8x128xf32>
    %cst_44 = arith.constant 1.000000e+00 : f32
    %198 = vector.broadcast %cst_44 : f32 to vector<8x128xf32>
    %199 = arith.subf %197, %198 : vector<8x128xf32>
    %200 = arith.select %5, %199, %196 : vector<8x128xi1>, vector<8x128xf32>
    %201 = vector.extract_strided_slice %200 {offsets = [0, 0], sizes = [8, 32], strides = [1, 1]} : vector<8x128xf32> to vector<8x32xf32>
    %202 = vector.extract_strided_slice %200 {offsets = [0, 32], sizes = [8, 32], strides = [1, 1]} : vector<8x128xf32> to vector<8x32xf32>
    %203 = vector.extract_strided_slice %200 {offsets = [0, 64], sizes = [8, 32], strides = [1, 1]} : vector<8x128xf32> to vector<8x32xf32>
    %204 = vector.extract_strided_slice %200 {offsets = [0, 96], sizes = [8, 32], strides = [1, 1]} : vector<8x128xf32> to vector<8x32xf32>
    %205 = arith.mulf %202, %158 : vector<8x32xf32>
    %206 = arith.mulf %201, %203 : vector<8x32xf32>
    %207 = arith.addf %205, %206 : vector<8x32xf32>
    %208 = math.tanh %207 : vector<8x32xf32>
    %209 = arith.mulf %204, %208 : vector<8x32xf32>
    %210 = vector.extract_strided_slice %187 {offsets = [0, 128], sizes = [8, 128], strides = [1, 1]} : vector<8x256xf32> to vector<8x128xf32>
    %211 = vector.broadcast %14 : vector<1x128xf32> to vector<8x128xf32>
    %212 = arith.addf %211, %210 : vector<8x128xf32>
    %213 = arith.addf %212, %212 : vector<8x128xf32>
    %214 = arith.select %5, %213, %212 : vector<8x128xi1>, vector<8x128xf32>
    %215 = arith.negf %214 : vector<8x128xf32>
    %216 = math.exp %215 : vector<8x128xf32>
    %cst_45 = arith.constant 1.000000e+00 : f32
    %217 = vector.broadcast %cst_45 : f32 to vector<8x128xf32>
    %218 = arith.addf %217, %216 : vector<8x128xf32>
    %219 = arith.divf %217, %218 : vector<8x128xf32>
    %220 = arith.addf %219, %219 : vector<8x128xf32>
    %cst_46 = arith.constant 1.000000e+00 : f32
    %221 = vector.broadcast %cst_46 : f32 to vector<8x128xf32>
    %222 = arith.subf %220, %221 : vector<8x128xf32>
    %223 = arith.select %5, %222, %219 : vector<8x128xi1>, vector<8x128xf32>
    %224 = vector.extract_strided_slice %223 {offsets = [0, 0], sizes = [8, 32], strides = [1, 1]} : vector<8x128xf32> to vector<8x32xf32>
    %225 = vector.extract_strided_slice %223 {offsets = [0, 32], sizes = [8, 32], strides = [1, 1]} : vector<8x128xf32> to vector<8x32xf32>
    %226 = vector.extract_strided_slice %223 {offsets = [0, 64], sizes = [8, 32], strides = [1, 1]} : vector<8x128xf32> to vector<8x32xf32>
    %227 = vector.extract_strided_slice %223 {offsets = [0, 96], sizes = [8, 32], strides = [1, 1]} : vector<8x128xf32> to vector<8x32xf32>
    %228 = arith.mulf %225, %181 : vector<8x32xf32>
    %229 = arith.mulf %224, %226 : vector<8x32xf32>
    %230 = arith.addf %228, %229 : vector<8x32xf32>
    %231 = math.tanh %230 : vector<8x32xf32>
    %232 = arith.mulf %227, %231 : vector<8x32xf32>
    %c40 = arith.constant 40 : index
    %c0_47 = arith.constant 0 : index
    %233 = vector.load %arg9[%c40, %c0_47] : memref<64x128xf32, #tpu.memory_space<vmem>>, vector<8x128xf32>
    %234 = tpu.concatenate %209, %232 in 1 : vector<8x32xf32>, vector<8x32xf32> -> vector<8x64xf32>
    %c0_48 = arith.constant 0 : index
    %c0_49 = arith.constant 0 : index
    %235 = vector.load %arg4[%c0_48, %c0_49] : memref<64x256xf32, #tpu.memory_space<vmem>>, vector<64x256xf32>
    %cst_50 = arith.constant dense<0.000000e+00> : vector<8x256xf32>
    %236 = tpu.matmul %234, %235, %cst_50 {dimension_numbers = #tpu.dot_dimension_numbers<[1], [0], [0], [1], [0, 0, 1, 1], [], []>} : vector<8x64xf32>, vector<64x256xf32>, vector<8x256xf32> -> vector<8x256xf32>
    %237 = vector.extract_strided_slice %236 {offsets = [0, 0], sizes = [8, 128], strides = [1, 1]} : vector<8x256xf32> to vector<8x128xf32>
    %238 = arith.addf %233, %237 : vector<8x128xf32>
    %239 = arith.addf %238, %238 : vector<8x128xf32>
    %240 = arith.select %5, %239, %238 : vector<8x128xi1>, vector<8x128xf32>
    %241 = arith.negf %240 : vector<8x128xf32>
    %242 = math.exp %241 : vector<8x128xf32>
    %cst_51 = arith.constant 1.000000e+00 : f32
    %243 = vector.broadcast %cst_51 : f32 to vector<8x128xf32>
    %244 = arith.addf %243, %242 : vector<8x128xf32>
    %245 = arith.divf %243, %244 : vector<8x128xf32>
    %246 = arith.addf %245, %245 : vector<8x128xf32>
    %cst_52 = arith.constant 1.000000e+00 : f32
    %247 = vector.broadcast %cst_52 : f32 to vector<8x128xf32>
    %248 = arith.subf %246, %247 : vector<8x128xf32>
    %249 = arith.select %5, %248, %245 : vector<8x128xi1>, vector<8x128xf32>
    %250 = vector.extract_strided_slice %249 {offsets = [0, 0], sizes = [8, 32], strides = [1, 1]} : vector<8x128xf32> to vector<8x32xf32>
    %251 = vector.extract_strided_slice %249 {offsets = [0, 32], sizes = [8, 32], strides = [1, 1]} : vector<8x128xf32> to vector<8x32xf32>
    %252 = vector.extract_strided_slice %249 {offsets = [0, 64], sizes = [8, 32], strides = [1, 1]} : vector<8x128xf32> to vector<8x32xf32>
    %253 = vector.extract_strided_slice %249 {offsets = [0, 96], sizes = [8, 32], strides = [1, 1]} : vector<8x128xf32> to vector<8x32xf32>
    %254 = arith.mulf %251, %207 : vector<8x32xf32>
    %255 = arith.mulf %250, %252 : vector<8x32xf32>
    %256 = arith.addf %254, %255 : vector<8x32xf32>
    %257 = math.tanh %256 : vector<8x32xf32>
    %258 = arith.mulf %253, %257 : vector<8x32xf32>
    %259 = vector.extract_strided_slice %236 {offsets = [0, 128], sizes = [8, 128], strides = [1, 1]} : vector<8x256xf32> to vector<8x128xf32>
    %260 = vector.broadcast %14 : vector<1x128xf32> to vector<8x128xf32>
    %261 = arith.addf %260, %259 : vector<8x128xf32>
    %262 = arith.addf %261, %261 : vector<8x128xf32>
    %263 = arith.select %5, %262, %261 : vector<8x128xi1>, vector<8x128xf32>
    %264 = arith.negf %263 : vector<8x128xf32>
    %265 = math.exp %264 : vector<8x128xf32>
    %cst_53 = arith.constant 1.000000e+00 : f32
    %266 = vector.broadcast %cst_53 : f32 to vector<8x128xf32>
    %267 = arith.addf %266, %265 : vector<8x128xf32>
    %268 = arith.divf %266, %267 : vector<8x128xf32>
    %269 = arith.addf %268, %268 : vector<8x128xf32>
    %cst_54 = arith.constant 1.000000e+00 : f32
    %270 = vector.broadcast %cst_54 : f32 to vector<8x128xf32>
    %271 = arith.subf %269, %270 : vector<8x128xf32>
    %272 = arith.select %5, %271, %268 : vector<8x128xi1>, vector<8x128xf32>
    %273 = vector.extract_strided_slice %272 {offsets = [0, 0], sizes = [8, 32], strides = [1, 1]} : vector<8x128xf32> to vector<8x32xf32>
    %274 = vector.extract_strided_slice %272 {offsets = [0, 32], sizes = [8, 32], strides = [1, 1]} : vector<8x128xf32> to vector<8x32xf32>
    %275 = vector.extract_strided_slice %272 {offsets = [0, 64], sizes = [8, 32], strides = [1, 1]} : vector<8x128xf32> to vector<8x32xf32>
    %276 = vector.extract_strided_slice %272 {offsets = [0, 96], sizes = [8, 32], strides = [1, 1]} : vector<8x128xf32> to vector<8x32xf32>
    %277 = arith.mulf %274, %230 : vector<8x32xf32>
    %278 = arith.mulf %273, %275 : vector<8x32xf32>
    %279 = arith.addf %277, %278 : vector<8x32xf32>
    %280 = math.tanh %279 : vector<8x32xf32>
    %281 = arith.mulf %276, %280 : vector<8x32xf32>
    %c48 = arith.constant 48 : index
    %c0_55 = arith.constant 0 : index
    %282 = vector.load %arg9[%c48, %c0_55] : memref<64x128xf32, #tpu.memory_space<vmem>>, vector<8x128xf32>
    %283 = tpu.concatenate %258, %281 in 1 : vector<8x32xf32>, vector<8x32xf32> -> vector<8x64xf32>
    %c0_56 = arith.constant 0 : index
    %c0_57 = arith.constant 0 : index
    %284 = vector.load %arg4[%c0_56, %c0_57] : memref<64x256xf32, #tpu.memory_space<vmem>>, vector<64x256xf32>
    %cst_58 = arith.constant dense<0.000000e+00> : vector<8x256xf32>
    %285 = tpu.matmul %283, %284, %cst_58 {dimension_numbers = #tpu.dot_dimension_numbers<[1], [0], [0], [1], [0, 0, 1, 1], [], []>} : vector<8x64xf32>, vector<64x256xf32>, vector<8x256xf32> -> vector<8x256xf32>
    %286 = vector.extract_strided_slice %285 {offsets = [0, 0], sizes = [8, 128], strides = [1, 1]} : vector<8x256xf32> to vector<8x128xf32>
    %287 = arith.addf %282, %286 : vector<8x128xf32>
    %288 = arith.addf %287, %287 : vector<8x128xf32>
    %289 = arith.select %5, %288, %287 : vector<8x128xi1>, vector<8x128xf32>
    %290 = arith.negf %289 : vector<8x128xf32>
    %291 = math.exp %290 : vector<8x128xf32>
    %cst_59 = arith.constant 1.000000e+00 : f32
    %292 = vector.broadcast %cst_59 : f32 to vector<8x128xf32>
    %293 = arith.addf %292, %291 : vector<8x128xf32>
    %294 = arith.divf %292, %293 : vector<8x128xf32>
    %295 = arith.addf %294, %294 : vector<8x128xf32>
    %cst_60 = arith.constant 1.000000e+00 : f32
    %296 = vector.broadcast %cst_60 : f32 to vector<8x128xf32>
    %297 = arith.subf %295, %296 : vector<8x128xf32>
    %298 = arith.select %5, %297, %294 : vector<8x128xi1>, vector<8x128xf32>
    %299 = vector.extract_strided_slice %298 {offsets = [0, 0], sizes = [8, 32], strides = [1, 1]} : vector<8x128xf32> to vector<8x32xf32>
    %300 = vector.extract_strided_slice %298 {offsets = [0, 32], sizes = [8, 32], strides = [1, 1]} : vector<8x128xf32> to vector<8x32xf32>
    %301 = vector.extract_strided_slice %298 {offsets = [0, 64], sizes = [8, 32], strides = [1, 1]} : vector<8x128xf32> to vector<8x32xf32>
    %302 = vector.extract_strided_slice %298 {offsets = [0, 96], sizes = [8, 32], strides = [1, 1]} : vector<8x128xf32> to vector<8x32xf32>
    %303 = arith.mulf %300, %256 : vector<8x32xf32>
    %304 = arith.mulf %299, %301 : vector<8x32xf32>
    %305 = arith.addf %303, %304 : vector<8x32xf32>
    %306 = math.tanh %305 : vector<8x32xf32>
    %307 = arith.mulf %302, %306 : vector<8x32xf32>
    %308 = vector.extract_strided_slice %285 {offsets = [0, 128], sizes = [8, 128], strides = [1, 1]} : vector<8x256xf32> to vector<8x128xf32>
    %309 = vector.broadcast %14 : vector<1x128xf32> to vector<8x128xf32>
    %310 = arith.addf %309, %308 : vector<8x128xf32>
    %311 = arith.addf %310, %310 : vector<8x128xf32>
    %312 = arith.select %5, %311, %310 : vector<8x128xi1>, vector<8x128xf32>
    %313 = arith.negf %312 : vector<8x128xf32>
    %314 = math.exp %313 : vector<8x128xf32>
    %cst_61 = arith.constant 1.000000e+00 : f32
    %315 = vector.broadcast %cst_61 : f32 to vector<8x128xf32>
    %316 = arith.addf %315, %314 : vector<8x128xf32>
    %317 = arith.divf %315, %316 : vector<8x128xf32>
    %318 = arith.addf %317, %317 : vector<8x128xf32>
    %cst_62 = arith.constant 1.000000e+00 : f32
    %319 = vector.broadcast %cst_62 : f32 to vector<8x128xf32>
    %320 = arith.subf %318, %319 : vector<8x128xf32>
    %321 = arith.select %5, %320, %317 : vector<8x128xi1>, vector<8x128xf32>
    %322 = vector.extract_strided_slice %321 {offsets = [0, 0], sizes = [8, 32], strides = [1, 1]} : vector<8x128xf32> to vector<8x32xf32>
    %323 = vector.extract_strided_slice %321 {offsets = [0, 32], sizes = [8, 32], strides = [1, 1]} : vector<8x128xf32> to vector<8x32xf32>
    %324 = vector.extract_strided_slice %321 {offsets = [0, 64], sizes = [8, 32], strides = [1, 1]} : vector<8x128xf32> to vector<8x32xf32>
    %325 = vector.extract_strided_slice %321 {offsets = [0, 96], sizes = [8, 32], strides = [1, 1]} : vector<8x128xf32> to vector<8x32xf32>
    %326 = arith.mulf %323, %279 : vector<8x32xf32>
    %327 = arith.mulf %322, %324 : vector<8x32xf32>
    %328 = arith.addf %326, %327 : vector<8x32xf32>
    %329 = math.tanh %328 : vector<8x32xf32>
    %330 = arith.mulf %325, %329 : vector<8x32xf32>
    %c56 = arith.constant 56 : index
    %c0_63 = arith.constant 0 : index
    %331 = vector.load %arg9[%c56, %c0_63] : memref<64x128xf32, #tpu.memory_space<vmem>>, vector<8x128xf32>
    %332 = tpu.concatenate %307, %330 in 1 : vector<8x32xf32>, vector<8x32xf32> -> vector<8x64xf32>
    %c0_64 = arith.constant 0 : index
    %c0_65 = arith.constant 0 : index
    %333 = vector.load %arg4[%c0_64, %c0_65] : memref<64x256xf32, #tpu.memory_space<vmem>>, vector<64x256xf32>
    %cst_66 = arith.constant dense<0.000000e+00> : vector<8x256xf32>
    %334 = tpu.matmul %332, %333, %cst_66 {dimension_numbers = #tpu.dot_dimension_numbers<[1], [0], [0], [1], [0, 0, 1, 1], [], []>} : vector<8x64xf32>, vector<64x256xf32>, vector<8x256xf32> -> vector<8x256xf32>
    %335 = vector.extract_strided_slice %334 {offsets = [0, 0], sizes = [8, 128], strides = [1, 1]} : vector<8x256xf32> to vector<8x128xf32>
    %336 = arith.addf %331, %335 : vector<8x128xf32>
    %337 = arith.addf %336, %336 : vector<8x128xf32>
    %338 = arith.select %5, %337, %336 : vector<8x128xi1>, vector<8x128xf32>
    %339 = arith.negf %338 : vector<8x128xf32>
    %340 = math.exp %339 : vector<8x128xf32>
    %cst_67 = arith.constant 1.000000e+00 : f32
    %341 = vector.broadcast %cst_67 : f32 to vector<8x128xf32>
    %342 = arith.addf %341, %340 : vector<8x128xf32>
    %343 = arith.divf %341, %342 : vector<8x128xf32>
    %344 = arith.addf %343, %343 : vector<8x128xf32>
    %cst_68 = arith.constant 1.000000e+00 : f32
    %345 = vector.broadcast %cst_68 : f32 to vector<8x128xf32>
    %346 = arith.subf %344, %345 : vector<8x128xf32>
    %347 = arith.select %5, %346, %343 : vector<8x128xi1>, vector<8x128xf32>
    %348 = vector.extract_strided_slice %347 {offsets = [0, 0], sizes = [8, 32], strides = [1, 1]} : vector<8x128xf32> to vector<8x32xf32>
    %349 = vector.extract_strided_slice %347 {offsets = [0, 32], sizes = [8, 32], strides = [1, 1]} : vector<8x128xf32> to vector<8x32xf32>
    %350 = vector.extract_strided_slice %347 {offsets = [0, 64], sizes = [8, 32], strides = [1, 1]} : vector<8x128xf32> to vector<8x32xf32>
    %351 = vector.extract_strided_slice %347 {offsets = [0, 96], sizes = [8, 32], strides = [1, 1]} : vector<8x128xf32> to vector<8x32xf32>
    %352 = arith.mulf %349, %305 : vector<8x32xf32>
    %353 = arith.mulf %348, %350 : vector<8x32xf32>
    %354 = arith.addf %352, %353 : vector<8x32xf32>
    %355 = math.tanh %354 : vector<8x32xf32>
    %356 = arith.mulf %351, %355 : vector<8x32xf32>
    %357 = vector.extract_strided_slice %334 {offsets = [0, 128], sizes = [8, 128], strides = [1, 1]} : vector<8x256xf32> to vector<8x128xf32>
    %358 = vector.broadcast %14 : vector<1x128xf32> to vector<8x128xf32>
    %359 = arith.addf %358, %357 : vector<8x128xf32>
    %360 = arith.addf %359, %359 : vector<8x128xf32>
    %361 = arith.select %5, %360, %359 : vector<8x128xi1>, vector<8x128xf32>
    %362 = arith.negf %361 : vector<8x128xf32>
    %363 = math.exp %362 : vector<8x128xf32>
    %cst_69 = arith.constant 1.000000e+00 : f32
    %364 = vector.broadcast %cst_69 : f32 to vector<8x128xf32>
    %365 = arith.addf %364, %363 : vector<8x128xf32>
    %366 = arith.divf %364, %365 : vector<8x128xf32>
    %367 = arith.addf %366, %366 : vector<8x128xf32>
    %cst_70 = arith.constant 1.000000e+00 : f32
    %368 = vector.broadcast %cst_70 : f32 to vector<8x128xf32>
    %369 = arith.subf %367, %368 : vector<8x128xf32>
    %370 = arith.select %5, %369, %366 : vector<8x128xi1>, vector<8x128xf32>
    %371 = vector.extract_strided_slice %370 {offsets = [0, 0], sizes = [8, 32], strides = [1, 1]} : vector<8x128xf32> to vector<8x32xf32>
    %372 = vector.extract_strided_slice %370 {offsets = [0, 32], sizes = [8, 32], strides = [1, 1]} : vector<8x128xf32> to vector<8x32xf32>
    %373 = vector.extract_strided_slice %370 {offsets = [0, 64], sizes = [8, 32], strides = [1, 1]} : vector<8x128xf32> to vector<8x32xf32>
    %374 = vector.extract_strided_slice %370 {offsets = [0, 96], sizes = [8, 32], strides = [1, 1]} : vector<8x128xf32> to vector<8x32xf32>
    %375 = arith.mulf %372, %328 : vector<8x32xf32>
    %376 = arith.mulf %371, %373 : vector<8x32xf32>
    %377 = arith.addf %375, %376 : vector<8x32xf32>
    %378 = math.tanh %377 : vector<8x32xf32>
    %379 = arith.mulf %374, %378 : vector<8x32xf32>
    %380 = tpu.concatenate %356, %379 in 1 : vector<8x32xf32>, vector<8x32xf32> -> vector<8x64xf32>
    %c0_71 = arith.constant 0 : index
    %c0_72 = arith.constant 0 : index
    %381 = vector.load %arg4[%c0_71, %c0_72] : memref<64x256xf32, #tpu.memory_space<vmem>>, vector<64x256xf32>
    %cst_73 = arith.constant dense<0.000000e+00> : vector<8x256xf32>
    %382 = tpu.matmul %380, %381, %cst_73 {dimension_numbers = #tpu.dot_dimension_numbers<[1], [0], [0], [1], [0, 0, 1, 1], [], []>} : vector<8x64xf32>, vector<64x256xf32>, vector<8x256xf32> -> vector<8x256xf32>
    %383 = vector.extract_strided_slice %382 {offsets = [0, 128], sizes = [8, 128], strides = [1, 1]} : vector<8x256xf32> to vector<8x128xf32>
    %384 = vector.broadcast %14 : vector<1x128xf32> to vector<8x128xf32>
    %385 = arith.addf %384, %383 : vector<8x128xf32>
    %386 = arith.addf %385, %385 : vector<8x128xf32>
    %387 = arith.select %5, %386, %385 : vector<8x128xi1>, vector<8x128xf32>
    %388 = arith.negf %387 : vector<8x128xf32>
    %389 = math.exp %388 : vector<8x128xf32>
    %cst_74 = arith.constant 1.000000e+00 : f32
    %390 = vector.broadcast %cst_74 : f32 to vector<8x128xf32>
    %391 = arith.addf %390, %389 : vector<8x128xf32>
    %392 = arith.divf %390, %391 : vector<8x128xf32>
    %393 = arith.addf %392, %392 : vector<8x128xf32>
    %cst_75 = arith.constant 1.000000e+00 : f32
    %394 = vector.broadcast %cst_75 : f32 to vector<8x128xf32>
    %395 = arith.subf %393, %394 : vector<8x128xf32>
    %396 = arith.select %5, %395, %392 : vector<8x128xi1>, vector<8x128xf32>
    %397 = vector.extract_strided_slice %396 {offsets = [0, 0], sizes = [8, 32], strides = [1, 1]} : vector<8x128xf32> to vector<8x32xf32>
    %398 = vector.extract_strided_slice %396 {offsets = [0, 32], sizes = [8, 32], strides = [1, 1]} : vector<8x128xf32> to vector<8x32xf32>
    %399 = vector.extract_strided_slice %396 {offsets = [0, 64], sizes = [8, 32], strides = [1, 1]} : vector<8x128xf32> to vector<8x32xf32>
    %400 = vector.extract_strided_slice %396 {offsets = [0, 96], sizes = [8, 32], strides = [1, 1]} : vector<8x128xf32> to vector<8x32xf32>
    %401 = arith.mulf %398, %377 : vector<8x32xf32>
    %402 = arith.mulf %397, %399 : vector<8x32xf32>
    %403 = arith.addf %401, %402 : vector<8x32xf32>
    %404 = math.tanh %403 : vector<8x32xf32>
    %405 = arith.mulf %400, %404 : vector<8x32xf32>
    %c0_76 = arith.constant 0 : index
    %c0_77 = arith.constant 0 : index
    %406 = vector.load %arg6[%c0_76, %c0_77] : memref<32x4xf32, #tpu.memory_space<vmem>>, vector<32x4xf32>
    %cst_78 = arith.constant dense<0.000000e+00> : vector<8x4xf32>
    %407 = tpu.matmul %405, %406, %cst_78 {dimension_numbers = #tpu.dot_dimension_numbers<[1], [0], [0], [1], [0, 0, 1, 1], [], []>} : vector<8x32xf32>, vector<32x4xf32>, vector<8x4xf32> -> vector<8x4xf32>
    %c0_79 = arith.constant 0 : index
    %c0_80 = arith.constant 0 : index
    %408 = vector.load %arg7[%c0_79, %c0_80] : memref<1x4xf32, #tpu.memory_space<vmem>>, vector<1x4xf32>
    %409 = vector.broadcast %408 : vector<1x4xf32> to vector<8x4xf32>
    %410 = arith.addf %407, %409 : vector<8x4xf32>
    %c0_81 = arith.constant 0 : index
    %c0_82 = arith.constant 0 : index
    %c0_83 = arith.constant 0 : index
    %411 = vector.load %arg8[%c0_81, %c0_82, %c0_83] : memref<1x8x4xf32, #tpu.memory_space<vmem>>, vector<1x8x4xf32>
    %412 = vector.shape_cast %411 : vector<1x8x4xf32> to vector<8x4xf32>
    %413 = vector.shape_cast %410 : vector<8x4xf32> to vector<1x8x4xf32>
    tpu.vector_store %arg8[%c0_81, %c0_82, %c0_83], %413 {strides = array<i32>} : memref<1x8x4xf32, #tpu.memory_space<vmem>>, vector<1x8x4xf32>,
    return
  }
  func.func @transform_0(%arg0: i32) -> (i32, i32, i32) {
    %c0_i32 = arith.constant 0 : i32
    %c0_i32_0 = arith.constant 0 : i32
    %c0_i32_1 = arith.constant 0 : i32
    return %arg0, %c0_i32, %c0_i32_0 : i32, i32, i32
  }
  func.func @transform_1(%arg0: i32) -> (i32, i32) {
    %c0_i32 = arith.constant 0 : i32
    %c0_i32_0 = arith.constant 0 : i32
    %c0_i32_1 = arith.constant 0 : i32
    return %c0_i32, %c0_i32_0 : i32, i32
  }
  func.func @transform_2(%arg0: i32) -> (i32, i32) {
    %c0_i32 = arith.constant 0 : i32
    %c0_i32_0 = arith.constant 0 : i32
    %c0_i32_1 = arith.constant 0 : i32
    return %c0_i32, %c0_i32_0 : i32, i32
  }
  func.func @transform_3(%arg0: i32) -> (i32, i32) {
    %c0_i32 = arith.constant 0 : i32
    %c0_i32_0 = arith.constant 0 : i32
    %c0_i32_1 = arith.constant 0 : i32
    return %c0_i32, %c0_i32_0 : i32, i32
  }
  func.func @transform_4(%arg0: i32) -> (i32, i32) {
    %c0_i32 = arith.constant 0 : i32
    %c0_i32_0 = arith.constant 0 : i32
    %c0_i32_1 = arith.constant 0 : i32
    return %c0_i32, %c0_i32_0 : i32, i32
  }
  func.func @transform_5(%arg0: i32) -> (i32, i32) {
    %c0_i32 = arith.constant 0 : i32
    %c0_i32_0 = arith.constant 0 : i32
    %c0_i32_1 = arith.constant 0 : i32
    return %c0_i32, %c0_i32_0 : i32, i32
  }
  func.func @transform_6(%arg0: i32) -> (i32, i32) {
    %c0_i32 = arith.constant 0 : i32
    %c0_i32_0 = arith.constant 0 : i32
    %c0_i32_1 = arith.constant 0 : i32
    return %c0_i32, %c0_i32_0 : i32, i32
  }
  func.func @transform_7(%arg0: i32) -> (i32, i32, i32) {
    %c0_i32 = arith.constant 0 : i32
    %c0_i32_0 = arith.constant 0 : i32
    %c0_i32_1 = arith.constant 0 : i32
    return %arg0, %c0_i32, %c0_i32_0 : i32, i32, i32
  }
}

</mosaic_0001>

<bundles_post_ra>
// kernel: lstm_classifier_forward.1
= control target key start
LH: loop header
LB: loop body
LE: loop exit
PB: predicated region body
PF: predicated region fallthrough
CT: control target
= control target key end

     0   :  { %vm50_vm0 = vcmask 261120   ;;  %v26_v6 = vlaneseq  ;;  %s1636_s15 = smov 32   ;;  %v1637_v44 = vmov 0.0   ;;  %vm240_vm4 = vcmask 523264   ;;  %s2207_s1 = inlined_call_operand.vmem [shape: f32[32,128], index: 1, kind: input, shape index: {}]   ;;  %s2208_s0 = inlined_call_operand.vmem [shape: f32[1,64,32], index: 0, kind: input, shape index: {}]   ;;  %s2209_s2 = inlined_call_operand.vmem [shape: f32[1,128], index: 2, kind: input, shape index: {}]   ;;  %s2210_s3 = inlined_call_operand.vmem [shape: f32[64,256], index: 3, kind: input, shape index: {}]   ;;  %s2211_s4 = inlined_call_operand.vmem [shape: f32[1,128], index: 4, kind: input, shape index: {}]   ;;  %s2212_s5 = inlined_call_operand.vmem [shape: f32[32,4], index: 5, kind: input, shape index: {}]   ;;  %s2213_s6 = inlined_call_operand.vmem [shape: f32[1,4], index: 6, kind: input, shape index: {}]   ;;  %s2214_s7 = inlined_call_operand.vmem [shape: f32[1,8,4], index: 7, kind: output, shape index: {}]  }
   0x1   :  { %v42_v0 = vld [vmem:[%s2207_s1 + $0x18] sm:$0xff]  ;;  %v41_v1 = vld [vmem:[%s2207_s1 + $0x10] sm:$0xff]  ;;  %v31_v2 = vld [vmem:[%s2208_s0] sm:$0xff]  ;;  %308 = vmatprep.mubr.f32.mxu1 %v1637_v44  ;;  %vm1638_vm5 = vmmov 0   ;;  %vm1428_vm6 = vcmask 31744  }
   0x2   :  { %1503 = vmatprep.subr.mxu0 %v42_v0  ;;  %v40_v3 = vld [vmem:[%s2207_s1 + $0x8] sm:$0xff]  ;;  %1511 = vmatprep.mubr.msk.f32.mxu0 %vm50_vm0, %v31_v2  ;;  %v39_v4 = vld [vmem:[%s2207_s1] sm:$0xff]  ;;  %v27_v7 = vand.u32 127, %v26_v6  ;;  %s1635_s1 = smov 64   ;;  %v1728_v27 = vld [vmem:[%s2210_s3 + $0x78] sm:$0xff] }
   0x3   :  { %1504 = vmatpush3.msra.mxu0 %v42_v0  ;;  %v32_v5 = vld [vmem:[%s2208_s0 + $0x8] sm:$0xff]  ;;  %v1704_v9 = vld [vmem:[%s2209_s2] ss:$0 sm:$0xff]  ;;  %v1733_v28 = vld [vmem:[%s2210_s3 + $0x70] sm:$0xff]  ;;  %260 = vmatprep.subr.mxu1 %v1728_v27 }
   0x4   :  { %1505 = vmatprep.subr.mxu0 %v41_v1  ;;  %vm28_vm1 = vcmp.ge.s32.totalorder %v27_v7, 64  ;;  %vm29_vm2 = vcmp.lt.s32.totalorder %v27_v7, 96  ;;  %v1738_v29 = vld [vmem:[%s2210_s3 + $0x68] sm:$0xff]  ;;  %v1744_v30 = vld [vmem:[%s2210_s3 + $0x60] sm:$0xff]  ;;  %261 = vmatpush1.msra.mxu1 %v1733_v28  ;;  %v1751_v31 = vld [vmem:[%s2210_s3 + $0x58] sm:$0xff] }
   0x5   :  { %1506 = vmatpush3.msra.mxu0 %v41_v1  ;;  %vm1707_vm3 = vmand %vm28_vm1, %vm29_vm2  ;;  %262 = vmatprep.subr.mxu1 %v1738_v29  ;;  %v1758_v32 = vld [vmem:[%s2210_s3 + $0x50] sm:$0xff]  ;;  %v1765_v33 = vld [vmem:[%s2210_s3 + $0x48] sm:$0xff] }
   0x6   :  { %1507 = vmatprep.subr.mxu0 %v40_v3  ;;  %263 = vmatpush1.msra.mxu1 %v1744_v30  ;;  %v1772_v34 = vld [vmem:[%s2210_s3 + $0x40] sm:$0xff]  ;;  %v1779_v35 = vld [vmem:[%s2210_s3 + $0x38] sm:$0xff]  ;;  %v1786_v36 = vld [vmem:[%s2210_s3 + $0x30] sm:$0xff] }
   0x7   :  { %1508 = vmatpush3.msra.mxu0 %v40_v3  ;;  %264 = vmatprep.subr.mxu1 %v1751_v31  ;;  %v1793_v37 = vld [vmem:[%s2210_s3 + $0x28] sm:$0xff]  ;;  %v1800_v39 = vld [vmem:[%s2210_s3 + $0x20] sm:$0xff]  ;;  %v1808_v40 = vld [vmem:[%s2210_s3 + $0x18] sm:$0xff] }
   0x8   :  { %1509 = vmatprep.subr.mxu0 %v39_v4  ;;  %265 = vmatpush1.msra.mxu1 %v1758_v32  ;;  %v1814_v41 = vld [vmem:[%s2210_s3 + $0x10] sm:$0xff]  ;;  %v1821_v42 = vld [vmem:[%s2210_s3 + $0x8] sm:$0xff]  ;;  %v1834_v43 = vld [vmem:[%s2210_s3] sm:$0xff] }
   0x9   :  { %1510 = vmatpush3.msra.mxu0 %v39_v4  ;;  %266 = vmatprep.subr.mxu1 %v1765_v33  ;;  %v1867_v51 = vld [vmem:[%s2211_s4] ss:$0 sm:$0xff]  ;;  %v1343_v12 = vld [vmem:[%s2212_s5 + $0x8] sm:$0xff] }
   0xa   :  { %1512 = vmatmul.mubr.msk.f32.vlgmr.msra.gmra.mxu0 %vm50_vm0, %v32_v5  ;;  %408 = vmatprep.subr.mxu0 %v1728_v27 }
   0xb   :  { %409 = vmatpush1.msra.mxu0 %v1733_v28  ;;  %267 = vmatpush1.msra.mxu1 %v1772_v34 }
   0xc   :  { %410 = vmatprep.subr.mxu0 %v1738_v29  ;;  %268 = vmatprep.subr.mxu1 %v1779_v35 }
   0xd   :  { %411 = vmatpush1.msra.mxu0 %v1744_v30  ;;  %269 = vmatpush1.msra.mxu1 %v1786_v36 }
   0xe   :  { %412 = vmatprep.subr.mxu0 %v1751_v31  ;;  %270 = vmatprep.subr.mxu1 %v1793_v37 }
   0xf   :  { %413 = vmatpush1.msra.mxu0 %v1758_v32  ;;  %271 = vmatpush1.msra.mxu1 %v1800_v39 }
  0x10   :  { %414 = vmatprep.subr.mxu0 %v1765_v33  ;;  %272 = vmatprep.subr.mxu1 %v1808_v40 }
  0x11   :  { %415 = vmatpush1.msra.mxu0 %v1772_v34  ;;  %273 = vmatpush1.msra.mxu1 %v1814_v41 }
  0x12   :  { %416 = vmatprep.subr.mxu0 %v1779_v35  ;;  %274 = vmatprep.subr.mxu1 %v1821_v42 }
  0x13   :  { %417 = vmatpush1.msra.mxu0 %v1786_v36  ;;  %275 = vmatpush1.msra.mxu1 %v1834_v43 }
  0x14   :  { %418 = vmatprep.subr.mxu0 %v1793_v37  ;;  %550 = vmatprep.subr.mxu1 %v1728_v27 }
  0x15   :  { %419 = vmatpush1.msra.mxu0 %v1800_v39 }
  0x16   :  { %420 = vmatprep.subr.mxu0 %v1808_v40 }
  0x17   :  { %421 = vmatpush1.msra.mxu0 %v1814_v41 }
  0x18   :  { %422 = vmatprep.subr.mxu0 %v1821_v42 }
  0x19   :  { %423 = vmatpush1.msra.mxu0 %v1834_v43 }
  0x1a   :  { %692 = vmatprep.subr.mxu0 %v1728_v27 }
  0xca   :  { %v1699_v8 = vpop.f32.mrf.mxu0 }
  0xcb   :  { %v147_v49 = vadd.f32 %v1699_v8, %v1704_v9 }
  0xcc   :  { %v141_v10 = vpop.f32.mrf.mxu0 }
  0xcd   :  { %v142_v11 = vadd.f32 %v1704_v9, %v141_v10 }
  0xcf   :  { %v190_v13 = vadd.f32 %v142_v11, %v142_v11 }
  0xd1   :  { %v191_v14 = vsel %vm1707_vm3, %v190_v13, %v142_v11 }
  0xd2   :  { %v1443_v15 = vmul.f32 -1.442695, %v191_v14 }
  0xd4   :  { %1538 = vpow2.f32 %v1443_v15 }
  0xe1   :  { %v1539_v16 = vpop.eup %1538 }
  0xe2   :  { %v195_v17 = vadd.f32 1.0, %v1539_v16 }
  0xe4   :  { %1540 = vrcp.f32 %v195_v17 }
  0xf1   :  { %v1541_v18 = vpop.eup %1540 }
  0xf2   :  { %v198_v19 = vadd.f32 %v1541_v18, %v1541_v18 }
  0xf4   :  { %v1444_v20 = vadd.f32 -1.0, %v198_v19 }
  0xf6   :  { %v1715_v21 = vsel %vm1707_vm3, %v1444_v20, %v1541_v18 }
  0xf7   :  { %203 = vrot.lane.b32.xlu0 %v1715_v21, %s1635_s1  ;;  %v201_v24 = vmul.f32 0.0, %v1715_v21 }
 0x169   :  { %v204_v22 = vpop.permute.xlu0 %203 }
 0x16a   :  { %v206_v23 = vmul.f32 %v204_v22, %v1715_v21  ;;  %v34_v22 = vld [vmem:[%s2208_s0 + $0x18] sm:$0xff] }
 0x16c   :  { %208 = vrot.lane.b32.xlu0 %v206_v23, %s1636_s15  ;;  %v35_v23 = vld [vmem:[%s2208_s0 + $0x20] sm:$0xff] }
 0x1de   :  { %v209_v25 = vpop.permute.xlu0 %208 }
 0x1df   :  { %v1722_v26 = vadd.f32 %v209_v25, %v201_v24  ;;  %v36_v24 = vld [vmem:[%s2208_s0 + $0x28] sm:$0xff]  ;;  %v37_v25 = vld [vmem:[%s2208_s0 + $0x30] sm:$0xff] }
 0x1e1   :  { %1542 = vtanh.f32 %v1722_v26 }
 0x1ee   :  { %v1543_v38 = vpop.eup %1542 }
 0x1ef   :  { %214 = vrot.lane.b32.xlu1 %v1543_v38, %s1635_s1 }
 0x261   :  { %v215_v45 = vpop.permute.xlu1 %214 }
 0x262   :  { %v217_v46 = vmul.f32 %v215_v45, %v1715_v21  ;;  %v33_v21 = vld [vmem:[%s2208_s0 + $0x10] sm:$0xff] }
 0x263   :  { %1514 = vmatprep.mubr.msk.f32.mxu0 %vm50_vm0, %v33_v21 }
 0x264   :  { %220 = vrot.lane.b32.xlu1 %v217_v46, %s1636_s15  ;;  %1515 = vmatmul.mubr.msk.f32.gmra.mxu0 %vm50_vm0, %v34_v22 }
 0x265   :  { %1517 = vmatprep.mubr.msk.f32.mxu0 %vm50_vm0, %v35_v23 }
 0x268   :  { %1518 = vmatmul.mubr.msk.f32.gmra.mxu0 %vm50_vm0, %v36_v24 }
 0x269   :  { %1520 = vmatprep.mubr.msk.f32.mxu0 %vm50_vm0, %v37_v25 }
 0x2d6   :  { %v221_v47 = vpop.permute.xlu1 %220 }
 0x2d7   :  { %v223_v48 = vsel %vm50_vm0, %v221_v47, 0.0 }
 0x2d8   :  { %1445 = vmatmul.mubr.msk.f32.vlgmr.msra.gmra.mxu1 %vm240_vm4, %v223_v48 }
 0x2d9   :  { %551 = vmatpush1.msra.mxu1 %v1733_v28  ;;  %598 = vmatprep.mubr.f32.mxu1 %v1637_v44 }
 0x2da   :  { %552 = vmatprep.subr.mxu1 %v1738_v29 }
 0x2db   :  { %553 = vmatpush1.msra.mxu1 %v1744_v30 }
 0x2dc   :  { %554 = vmatprep.subr.mxu1 %v1751_v31 }
 0x2dd   :  { %555 = vmatpush1.msra.mxu1 %v1758_v32 }
 0x2de   :  { %556 = vmatprep.subr.mxu1 %v1765_v33 }
 0x2df   :  { %557 = vmatpush1.msra.mxu1 %v1772_v34 }
 0x2e0   :  { %558 = vmatprep.subr.mxu1 %v1779_v35 }
 0x2e1   :  { %559 = vmatpush1.msra.mxu1 %v1786_v36 }
 0x2e2   :  { %560 = vmatprep.subr.mxu1 %v1793_v37 }
 0x2e3   :  { %561 = vmatpush1.msra.mxu1 %v1800_v39 }
 0x2e4   :  { %562 = vmatprep.subr.mxu1 %v1808_v40 }
 0x2e5   :  { %563 = vmatpush1.msra.mxu1 %v1814_v41 }
 0x2e6   :  { %564 = vmatprep.subr.mxu1 %v1821_v42 }
 0x2e7   :  { %565 = vmatpush1.msra.mxu1 %v1834_v43 }
 0x2e8   :  { %834 = vmatprep.subr.mxu1 %v1728_v27 }
 0x398   :  { %v310_v50 = vpop.f32.mrf.mxu1 }
 0x399   :  { %v315_v52 = vadd.f32 %v310_v50, %v147_v49 }
 0x39a   :  { %v312_v53 = vpop.f32.mrf.mxu1 }
 0x39b   :  { %v316_v54 = vadd.f32 %v315_v52, %v315_v52  ;;  %v350_v55 = vadd.f32 %v1867_v51, %v312_v53 }
 0x39d   :  { %v317_v56 = vsel %vm1707_vm3, %v316_v54, %v315_v52  ;;  %v351_v57 = vadd.f32 %v350_v55, %v350_v55  ;;  %v1937_v54 = vpop.f32.mrf.mxu0 }
 0x39e   :  { %v1446_v58 = vmul.f32 -1.442695, %v317_v56 }
 0x39f   :  { %v352_v59 = vsel %vm1707_vm3, %v351_v57, %v350_v55  ;;  %v151_v55 = vpop.f32.mrf.mxu0 }
 0x3a0   :  { %1544 = vpow2.f32 %v1446_v58  ;;  %v1449_v60 = vmul.f32 -1.442695, %v352_v59 }
 0x3a1   :  { %v1939_v56 = vpop.f32.mrf.mxu0 }
 0x3a2   :  { %1546 = vpow2.f32 %v1449_v60  ;;  %v152_v60 = vadd.f32 %v1704_v9, %v151_v55 }
 0x3a3   :  { %v1941_v57 = vpop.f32.mrf.mxu0 }
 0x3ad   :  { %v1545_v61 = vpop.eup %1544 }
 0x3ae   :  { %v321_v62 = vadd.f32 1.0, %v1545_v61 }
 0x3af   :  { %v1547_v63 = vpop.eup %1546 }
 0x3b0   :  { %1548 = vrcp.f32 %v321_v62  ;;  %v356_v0 = vadd.f32 1.0, %v1547_v63 }
 0x3b2   :  { %1550 = vrcp.f32 %v356_v0 }
 0x3bd   :  { %v1549_v1 = vpop.eup %1548 }
 0x3be   :  { %v324_v2 = vadd.f32 %v1549_v1, %v1549_v1 }
 0x3bf   :  { %v1551_v3 = vpop.eup %1550 }
 0x3c0   :  { %v1447_v4 = vadd.f32 -1.0, %v324_v2  ;;  %v359_v5 = vadd.f32 %v1551_v3, %v1551_v3 }
 0x3c2   :  { %v326_v6 = vsel %vm1707_vm3, %v1447_v4, %v1549_v1  ;;  %v1450_v7 = vadd.f32 -1.0, %v359_v5 }
 0x3c3   :  { %329 = vrot.lane.b32.xlu0 %v326_v6, %s1635_s1  ;;  %v327_v15 = vmul.f32 %v326_v6, %v1722_v26  ;;  %v38_v26 = vld [vmem:[%s2208_s0 + $0x38] sm:$0xff] }
 0x3c4   :  { %v361_v8 = vsel %vm1707_vm3, %v1450_v7, %v1551_v3  ;;  %1521 = vmatmul.mubr.msk.f32.gmra.mxu0 %vm50_vm0, %v38_v26 }
 0x3c5   :  { %364 = vrot.lane.b32.xlu1 %v361_v8, %s1635_s1  ;;  %v362_v18 = vmul.f32 0.0, %v361_v8  ;;  %456 = vmatprep.mubr.f32.mxu0 %v1637_v44 }
 0x435   :  { %v330_v10 = vpop.permute.xlu0 %329 }
 0x436   :  { %v332_v11 = vmul.f32 %v330_v10, %v326_v6 }
 0x437   :  { %v365_v13 = vpop.permute.xlu1 %364 }
 0x438   :  { %v367_v14 = vmul.f32 %v365_v13, %v361_v8  ;;  %334 = vrot.lane.b32.xlu0 %v332_v11, %s1636_s15 }
 0x43a   :  { %369 = vrot.lane.b32.xlu1 %v367_v14, %s1636_s15 }
 0x484   :  { %v1943_v58 = vpop.f32.mrf.mxu0 }
 0x486   :  { %v1945_v59 = vpop.f32.mrf.mxu0 }
 0x4aa   :  { %v335_v16 = vpop.permute.xlu0 %334 }
 0x4ab   :  { %v1883_v17 = vadd.f32 %v335_v16, %v327_v15 }
 0x4ac   :  { %v370_v19 = vpop.permute.xlu1 %369 }
 0x4ad   :  { %1552 = vtanh.f32 %v1883_v17  ;;  %v1886_v20 = vadd.f32 %v370_v19, %v362_v18 }
 0x4af   :  { %1554 = vtanh.f32 %v1886_v20 }
 0x4ba   :  { %v1553_v38 = vpop.eup %1552 }
 0x4bb   :  { %340 = vrot.lane.b32.xlu0 %v1553_v38, %s1635_s1 }
 0x4bc   :  { %v1555_v45 = vpop.eup %1554 }
 0x4bd   :  { %375 = vrot.lane.b32.xlu1 %v1555_v45, %s1635_s1 }
 0x52d   :  { %v341_v46 = vpop.permute.xlu0 %340 }
 0x52e   :  { %v343_v47 = vmul.f32 %v341_v46, %v326_v6 }
 0x52f   :  { %v376_v48 = vpop.permute.xlu1 %375 }
 0x530   :  { %v378_v49 = vmul.f32 %v376_v48, %v361_v8  ;;  %381 = vrot.lane.b32.xlu0 %v343_v47, %s1636_s15 }
 0x532   :  { %385 = vrot.lane.b32.xlu1 %v378_v49, %s1635_s1 }
 0x5a2   :  { %v382_v50 = vpop.permute.xlu0 %381 }
 0x5a4   :  { %v386_v52 = vpop.permute.xlu1 %385 }
 0x5a5   :  { %v388_v53 = vsel %vm50_vm0, %v382_v50, %v386_v52 }
 0x5a6   :  { %1451 = vmatmul.mubr.msk.f32.vlgmr.msra.gmra.mxu0 %vm240_vm4, %v388_v53 }
 0x5a7   :  { %693 = vmatpush1.msra.mxu0 %v1733_v28  ;;  %740 = vmatprep.mubr.f32.mxu0 %v1637_v44 }
 0x5a8   :  { %694 = vmatprep.subr.mxu0 %v1738_v29 }
 0x5a9   :  { %695 = vmatpush1.msra.mxu0 %v1744_v30 }
 0x5aa   :  { %696 = vmatprep.subr.mxu0 %v1751_v31 }
 0x5ab   :  { %697 = vmatpush1.msra.mxu0 %v1758_v32 }
 0x5ac   :  { %698 = vmatprep.subr.mxu0 %v1765_v33 }
 0x5ad   :  { %699 = vmatpush1.msra.mxu0 %v1772_v34 }
 0x5ae   :  { %700 = vmatprep.subr.mxu0 %v1779_v35 }
 0x5af   :  { %701 = vmatpush1.msra.mxu0 %v1786_v36 }
 0x5b0   :  { %702 = vmatprep.subr.mxu0 %v1793_v37 }
 0x5b1   :  { %703 = vmatpush1.msra.mxu0 %v1800_v39 }
 0x5b2   :  { %704 = vmatprep.subr.mxu0 %v1808_v40 }
 0x5b3   :  { %705 = vmatpush1.msra.mxu0 %v1814_v41 }
 0x5b4   :  { %706 = vmatprep.subr.mxu0 %v1821_v42 }
 0x5b5   :  { %707 = vmatpush1.msra.mxu0 %v1834_v43 }
 0x5b6   :  { %976 = vmatprep.subr.mxu0 %v1728_v27 }
 0x666   :  { %v458_v61 = vpop.f32.mrf.mxu0 }
 0x667   :  { %v463_v62 = vadd.f32 %v458_v61, %v152_v60 }
 0x668   :  { %v460_v63 = vpop.f32.mrf.mxu0 }
 0x669   :  { %v464_v0 = vadd.f32 %v463_v62, %v463_v62  ;;  %v492_v1 = vadd.f32 %v1867_v51, %v460_v63  ;;  %v157_v63 = vadd.f32 %v1937_v54, %v1704_v9 }
 0x66b   :  { %v465_v2 = vsel %vm1707_vm3, %v464_v0, %v463_v62  ;;  %v493_v3 = vadd.f32 %v492_v1, %v492_v1 }
 0x66c   :  { %v1452_v4 = vmul.f32 -1.442695, %v465_v2 }
 0x66d   :  { %v494_v5 = vsel %vm1707_vm3, %v493_v3, %v492_v1 }
 0x66e   :  { %1556 = vpow2.f32 %v1452_v4  ;;  %v1454_v6 = vmul.f32 -1.442695, %v494_v5 }
 0x670   :  { %1558 = vpow2.f32 %v1454_v6 }
 0x67b   :  { %v1557_v7 = vpop.eup %1556 }
 0x67c   :  { %v469_v8 = vadd.f32 1.0, %v1557_v7 }
 0x67d   :  { %v1559_v10 = vpop.eup %1558 }
 0x67e   :  { %1560 = vrcp.f32 %v469_v8  ;;  %v498_v11 = vadd.f32 1.0, %v1559_v10 }
 0x680   :  { %1562 = vrcp.f32 %v498_v11 }
 0x68b   :  { %v1561_v13 = vpop.eup %1560 }
 0x68c   :  { %v472_v14 = vadd.f32 %v1561_v13, %v1561_v13 }
 0x68d   :  { %v1563_v15 = vpop.eup %1562 }
 0x68e   :  { %v1453_v16 = vadd.f32 -1.0, %v472_v14  ;;  %v501_v18 = vadd.f32 %v1563_v15, %v1563_v15 }
 0x690   :  { %v474_v19 = vsel %vm1707_vm3, %v1453_v16, %v1561_v13  ;;  %v1455_v21 = vadd.f32 -1.0, %v501_v18 }
 0x691   :  { %477 = vrot.lane.b32.xlu0 %v474_v19, %s1635_s1  ;;  %v475_v38 = vmul.f32 %v474_v19, %v1883_v17 }
 0x692   :  { %v503_v22 = vsel %vm1707_vm3, %v1455_v21, %v1563_v15 }
 0x693   :  { %506 = vrot.lane.b32.xlu1 %v503_v22, %s1635_s1  ;;  %v504_v47 = vmul.f32 %v503_v22, %v1886_v20 }
 0x703   :  { %v478_v23 = vpop.permute.xlu0 %477 }
 0x704   :  { %v480_v24 = vmul.f32 %v478_v23, %v474_v19 }
 0x705   :  { %v507_v25 = vpop.permute.xlu1 %506 }
 0x706   :  { %v509_v26 = vmul.f32 %v507_v25, %v503_v22  ;;  %482 = vrot.lane.b32.xlu0 %v480_v24, %s1636_s15 }
 0x708   :  { %511 = vrot.lane.b32.xlu1 %v509_v26, %s1636_s15 }
 0x778   :  { %v483_v45 = vpop.permute.xlu0 %482 }
 0x779   :  { %v1962_v46 = vadd.f32 %v483_v45, %v475_v38 }
 0x77a   :  { %v512_v48 = vpop.permute.xlu1 %511 }
 0x77b   :  { %1564 = vtanh.f32 %v1962_v46  ;;  %v1966_v49 = vadd.f32 %v512_v48, %v504_v47 }
 0x77d   :  { %1566 = vtanh.f32 %v1966_v49 }
 0x788   :  { %v1565_v50 = vpop.eup %1564 }
 0x789   :  { %488 = vrot.lane.b32.xlu0 %v1565_v50, %s1635_s1 }
 0x78a   :  { %v1567_v52 = vpop.eup %1566 }
 0x78b   :  { %517 = vrot.lane.b32.xlu1 %v1567_v52, %s1635_s1 }
 0x7fb   :  { %v489_v53 = vpop.permute.xlu0 %488 }
 0x7fc   :  { %v491_v17 = vmul.f32 %v489_v53, %v474_v19 }
 0x7fd   :  { %v518_v55 = vpop.permute.xlu1 %517 }
 0x7fe   :  { %v520_v60 = vmul.f32 %v518_v55, %v503_v22  ;;  %523 = vrot.lane.b32.xlu0 %v491_v17, %s1636_s15 }
 0x800   :  { %527 = vrot.lane.b32.xlu1 %v520_v60, %s1635_s1 }
 0x870   :  { %v524_v20 = vpop.permute.xlu0 %523 }
 0x872   :  { %v528_v61 = vpop.permute.xlu1 %527 }
 0x873   :  { %v530_v62 = vsel %vm50_vm0, %v524_v20, %v528_v61 }
 0x874   :  { %1456 = vmatmul.mubr.msk.f32.vlgmr.msra.gmra.mxu1 %vm240_vm4, %v530_v62 }
 0x875   :  { %835 = vmatpush1.msra.mxu1 %v1733_v28  ;;  %882 = vmatprep.mubr.f32.mxu1 %v1637_v44 }
 0x876   :  { %836 = vmatprep.subr.mxu1 %v1738_v29 }
 0x877   :  { %837 = vmatpush1.msra.mxu1 %v1744_v30 }
 0x878   :  { %838 = vmatprep.subr.mxu1 %v1751_v31 }
 0x879   :  { %839 = vmatpush1.msra.mxu1 %v1758_v32 }
 0x87a   :  { %840 = vmatprep.subr.mxu1 %v1765_v33 }
 0x87b   :  { %841 = vmatpush1.msra.mxu1 %v1772_v34 }
 0x87c   :  { %842 = vmatprep.subr.mxu1 %v1779_v35 }
 0x87d   :  { %843 = vmatpush1.msra.mxu1 %v1786_v36 }
 0x87e   :  { %844 = vmatprep.subr.mxu1 %v1793_v37 }
 0x87f   :  { %845 = vmatpush1.msra.mxu1 %v1800_v39 }
 0x880   :  { %846 = vmatprep.subr.mxu1 %v1808_v40 }
 0x881   :  { %847 = vmatpush1.msra.mxu1 %v1814_v41 }
 0x882   :  { %848 = vmatprep.subr.mxu1 %v1821_v42 }
 0x883   :  { %849 = vmatpush1.msra.mxu1 %v1834_v43 }
 0x884   :  { %1118 = vmatprep.subr.mxu1 %v1728_v27 }
 0x934   :  { %v600_v0 = vpop.f32.mrf.mxu1 }
 0x935   :  { %v605_v1 = vadd.f32 %v600_v0, %v157_v63 }
 0x936   :  { %v602_v2 = vpop.f32.mrf.mxu1 }
 0x937   :  { %v606_v3 = vadd.f32 %v605_v1, %v605_v1  ;;  %v634_v4 = vadd.f32 %v1867_v51, %v602_v2 }
 0x939   :  { %v607_v5 = vsel %vm1707_vm3, %v606_v3, %v605_v1  ;;  %v635_v6 = vadd.f32 %v634_v4, %v634_v4  ;;  %v162_v1 = vadd.f32 %v1704_v9, %v1941_v57 }
 0x93a   :  { %v1457_v7 = vmul.f32 -1.442695, %v607_v5 }
 0x93b   :  { %v636_v8 = vsel %vm1707_vm3, %v635_v6, %v634_v4 }
 0x93c   :  { %1568 = vpow2.f32 %v1457_v7  ;;  %v1459_v10 = vmul.f32 -1.442695, %v636_v8 }
 0x93e   :  { %1570 = vpow2.f32 %v1459_v10 }
 0x949   :  { %v1569_v11 = vpop.eup %1568 }
 0x94a   :  { %v611_v13 = vadd.f32 1.0, %v1569_v11 }
 0x94b   :  { %v1571_v54 = vpop.eup %1570 }
 0x94c   :  { %1572 = vrcp.f32 %v611_v13  ;;  %v640_v14 = vadd.f32 1.0, %v1571_v54 }
 0x94e   :  { %1574 = vrcp.f32 %v640_v14 }
 0x959   :  { %v1573_v15 = vpop.eup %1572 }
 0x95a   :  { %v614_v16 = vadd.f32 %v1573_v15, %v1573_v15 }
 0x95b   :  { %v1575_v18 = vpop.eup %1574 }
 0x95c   :  { %v1458_v19 = vadd.f32 -1.0, %v614_v16  ;;  %v643_v21 = vadd.f32 %v1575_v18, %v1575_v18 }
 0x95e   :  { %v616_v22 = vsel %vm1707_vm3, %v1458_v19, %v1573_v15  ;;  %v1460_v23 = vadd.f32 -1.0, %v643_v21 }
 0x95f   :  { %619 = vrot.lane.b32.xlu0 %v616_v22, %s1635_s1  ;;  %v617_v47 = vmul.f32 %v616_v22, %v1962_v46 }
 0x960   :  { %v645_v24 = vsel %vm1707_vm3, %v1460_v23, %v1575_v18 }
 0x961   :  { %648 = vrot.lane.b32.xlu1 %v645_v24, %s1635_s1  ;;  %v646_v52 = vmul.f32 %v645_v24, %v1966_v49 }
 0x9d1   :  { %v620_v25 = vpop.permute.xlu0 %619 }
 0x9d2   :  { %v622_v26 = vmul.f32 %v620_v25, %v616_v22 }
 0x9d3   :  { %v649_v38 = vpop.permute.xlu1 %648 }
 0x9d4   :  { %v651_v45 = vmul.f32 %v649_v38, %v645_v24  ;;  %624 = vrot.lane.b32.xlu0 %v622_v26, %s1636_s15 }
 0x9d6   :  { %653 = vrot.lane.b32.xlu1 %v651_v45, %s1636_s15 }
 0xa46   :  { %v625_v48 = vpop.permute.xlu0 %624 }
 0xa47   :  { %v2008_v50 = vadd.f32 %v625_v48, %v617_v47 }
 0xa48   :  { %v654_v53 = vpop.permute.xlu1 %653 }
 0xa49   :  { %1576 = vtanh.f32 %v2008_v50  ;;  %v2012_v17 = vadd.f32 %v654_v53, %v646_v52 }
 0xa4b   :  { %1578 = vtanh.f32 %v2012_v17 }
 0xa56   :  { %v1577_v55 = vpop.eup %1576 }
 0xa57   :  { %630 = vrot.lane.b32.xlu0 %v1577_v55, %s1635_s1 }
 0xa58   :  { %v1579_v60 = vpop.eup %1578 }
 0xa59   :  { %659 = vrot.lane.b32.xlu1 %v1579_v60, %s1635_s1 }
 0xac9   :  { %v631_v20 = vpop.permute.xlu0 %630 }
 0xaca   :  { %v633_v46 = vmul.f32 %v631_v20, %v616_v22 }
 0xacb   :  { %v660_v61 = vpop.permute.xlu1 %659 }
 0xacc   :  { %v662_v62 = vmul.f32 %v660_v61, %v645_v24  ;;  %665 = vrot.lane.b32.xlu0 %v633_v46, %s1636_s15 }
 0xace   :  { %669 = vrot.lane.b32.xlu1 %v662_v62, %s1635_s1 }
 0xb3e   :  { %v666_v49 = vpop.permute.xlu0 %665 }
 0xb40   :  { %v670_v63 = vpop.permute.xlu1 %669 }
 0xb41   :  { %v672_v0 = vsel %vm50_vm0, %v666_v49, %v670_v63 }
 0xb42   :  { %1461 = vmatmul.mubr.msk.f32.vlgmr.msra.gmra.mxu0 %vm240_vm4, %v672_v0 }
 0xb43   :  { %977 = vmatpush1.msra.mxu0 %v1733_v28  ;;  %1024 = vmatprep.mubr.f32.mxu0 %v1637_v44 }
 0xb44   :  { %978 = vmatprep.subr.mxu0 %v1738_v29 }
 0xb45   :  { %979 = vmatpush1.msra.mxu0 %v1744_v30 }
 0xb46   :  { %980 = vmatprep.subr.mxu0 %v1751_v31 }
 0xb47   :  { %981 = vmatpush1.msra.mxu0 %v1758_v32 }
 0xb48   :  { %982 = vmatprep.subr.mxu0 %v1765_v33 }
 0xb49   :  { %983 = vmatpush1.msra.mxu0 %v1772_v34 }
 0xb4a   :  { %984 = vmatprep.subr.mxu0 %v1779_v35 }
 0xb4b   :  { %985 = vmatpush1.msra.mxu0 %v1786_v36 }
 0xb4c   :  { %986 = vmatprep.subr.mxu0 %v1793_v37 }
 0xb4d   :  { %987 = vmatpush1.msra.mxu0 %v1800_v39 }
 0xb4e   :  { %988 = vmatprep.subr.mxu0 %v1808_v40 }
 0xb4f   :  { %989 = vmatpush1.msra.mxu0 %v1814_v41 }
 0xb50   :  { %990 = vmatprep.subr.mxu0 %v1821_v42 }
 0xb51   :  { %991 = vmatpush1.msra.mxu0 %v1834_v43 }
 0xb52   :  { %1259 = vmatprep.subr.mxu0 %v1728_v27 }
 0xc02   :  { %v742_v2 = vpop.f32.mrf.mxu0 }
 0xc03   :  { %v747_v3 = vadd.f32 %v742_v2, %v162_v1  ;;  %v167_v1 = vadd.f32 %v1939_v56, %v1704_v9 }
 0xc04   :  { %v744_v4 = vpop.f32.mrf.mxu0 }
 0xc05   :  { %v748_v5 = vadd.f32 %v747_v3, %v747_v3  ;;  %v776_v6 = vadd.f32 %v1867_v51, %v744_v4 }
 0xc07   :  { %v749_v7 = vsel %vm1707_vm3, %v748_v5, %v747_v3  ;;  %v777_v8 = vadd.f32 %v776_v6, %v776_v6 }
 0xc08   :  { %v1462_v10 = vmul.f32 -1.442695, %v749_v7 }
 0xc09   :  { %v778_v11 = vsel %vm1707_vm3, %v777_v8, %v776_v6 }
 0xc0a   :  { %1580 = vpow2.f32 %v1462_v10  ;;  %v1464_v13 = vmul.f32 -1.442695, %v778_v11 }
 0xc0c   :  { %1582 = vpow2.f32 %v1464_v13 }
 0xc17   :  { %v1581_v27 = vpop.eup %1580 }
 0xc18   :  { %v753_v54 = vadd.f32 1.0, %v1581_v27 }
 0xc19   :  { %v1583_v57 = vpop.eup %1582 }
 0xc1a   :  { %1584 = vrcp.f32 %v753_v54  ;;  %v782_v14 = vadd.f32 1.0, %v1583_v57 }
 0xc1c   :  { %1586 = vrcp.f32 %v782_v14 }
 0xc27   :  { %v1585_v15 = vpop.eup %1584 }
 0xc28   :  { %v756_v16 = vadd.f32 %v1585_v15, %v1585_v15 }
 0xc29   :  { %v1587_v18 = vpop.eup %1586 }
 0xc2a   :  { %v1463_v19 = vadd.f32 -1.0, %v756_v16  ;;  %v785_v21 = vadd.f32 %v1587_v18, %v1587_v18 }
 0xc2c   :  { %v758_v22 = vsel %vm1707_vm3, %v1463_v19, %v1585_v15  ;;  %v1465_v23 = vadd.f32 -1.0, %v785_v21 }
 0xc2d   :  { %761 = vrot.lane.b32.xlu0 %v758_v22, %s1635_s1  ;;  %v759_v47 = vmul.f32 %v758_v22, %v2008_v50 }
 0xc2e   :  { %v787_v24 = vsel %vm1707_vm3, %v1465_v23, %v1587_v18 }
 0xc2f   :  { %790 = vrot.lane.b32.xlu1 %v787_v24, %s1635_s1  ;;  %v788_v53 = vmul.f32 %v787_v24, %v2012_v17 }
 0xc9f   :  { %v762_v25 = vpop.permute.xlu0 %761 }
 0xca0   :  { %v764_v26 = vmul.f32 %v762_v25, %v758_v22 }
 0xca1   :  { %v791_v38 = vpop.permute.xlu1 %790 }
 0xca2   :  { %v793_v45 = vmul.f32 %v791_v38, %v787_v24  ;;  %766 = vrot.lane.b32.xlu0 %v764_v26, %s1636_s15 }
 0xca4   :  { %795 = vrot.lane.b32.xlu1 %v793_v45, %s1636_s15 }
 0xd14   :  { %v767_v48 = vpop.permute.xlu0 %766 }
 0xd15   :  { %v2054_v52 = vadd.f32 %v767_v48, %v759_v47 }
 0xd16   :  { %v796_v55 = vpop.permute.xlu1 %795 }
 0xd17   :  { %1588 = vtanh.f32 %v2054_v52  ;;  %v2058_v60 = vadd.f32 %v796_v55, %v788_v53 }
 0xd19   :  { %1590 = vtanh.f32 %v2058_v60 }
 0xd24   :  { %v1589_v20 = vpop.eup %1588 }
 0xd25   :  { %772 = vrot.lane.b32.xlu0 %v1589_v20, %s1635_s1 }
 0xd26   :  { %v1591_v46 = vpop.eup %1590 }
 0xd27   :  { %801 = vrot.lane.b32.xlu1 %v1591_v46, %s1635_s1 }
 0xd97   :  { %v773_v61 = vpop.permute.xlu0 %772 }
 0xd98   :  { %v775_v50 = vmul.f32 %v773_v61, %v758_v22 }
 0xd99   :  { %v802_v62 = vpop.permute.xlu1 %801 }
 0xd9a   :  { %v804_v49 = vmul.f32 %v802_v62, %v787_v24  ;;  %807 = vrot.lane.b32.xlu0 %v775_v50, %s1636_s15 }
 0xd9c   :  { %811 = vrot.lane.b32.xlu1 %v804_v49, %s1635_s1 }
 0xe0c   :  { %v808_v17 = vpop.permute.xlu0 %807 }
 0xe0e   :  { %v812_v63 = vpop.permute.xlu1 %811 }
 0xe0f   :  { %v814_v0 = vsel %vm50_vm0, %v808_v17, %v812_v63 }
 0xe10   :  { %1466 = vmatmul.mubr.msk.f32.vlgmr.msra.gmra.mxu1 %vm240_vm4, %v814_v0 }
 0xe11   :  { %1119 = vmatpush1.msra.mxu1 %v1733_v28  ;;  %1166 = vmatprep.mubr.f32.mxu1 %v1637_v44 }
 0xe12   :  { %1120 = vmatprep.subr.mxu1 %v1738_v29 }
 0xe13   :  { %1121 = vmatpush1.msra.mxu1 %v1744_v30 }
 0xe14   :  { %1122 = vmatprep.subr.mxu1 %v1751_v31 }
 0xe15   :  { %1123 = vmatpush1.msra.mxu1 %v1758_v32 }
 0xe16   :  { %1124 = vmatprep.subr.mxu1 %v1765_v33 }
 0xe17   :  { %1125 = vmatpush1.msra.mxu1 %v1772_v34 }
 0xe18   :  { %1126 = vmatprep.subr.mxu1 %v1779_v35 }
 0xe19   :  { %1127 = vmatpush1.msra.mxu1 %v1786_v36 }
 0xe1a   :  { %1128 = vmatprep.subr.mxu1 %v1793_v37 }
 0xe1b   :  { %1129 = vmatpush1.msra.mxu1 %v1800_v39 }
 0xe1c   :  { %1130 = vmatprep.subr.mxu1 %v1808_v40 }
 0xe1d   :  { %1131 = vmatpush1.msra.mxu1 %v1814_v41 }
 0xe1e   :  { %1132 = vmatprep.subr.mxu1 %v1821_v42 }
 0xe1f   :  { %1133 = vmatpush1.msra.mxu1 %v1834_v43 }
 0xe20   :  { %1523 = vmatprep.subr.mxu1 %v1637_v44 }
 0xed0   :  { %v884_v2 = vpop.f32.mrf.mxu1 }
 0xed1   :  { %v889_v3 = vadd.f32 %v884_v2, %v167_v1 }
 0xed2   :  { %v886_v4 = vpop.f32.mrf.mxu1 }
 0xed3   :  { %v890_v5 = vadd.f32 %v889_v3, %v889_v3  ;;  %v918_v6 = vadd.f32 %v1867_v51, %v886_v4 }
 0xed5   :  { %v891_v7 = vsel %vm1707_vm3, %v890_v5, %v889_v3  ;;  %v919_v8 = vadd.f32 %v918_v6, %v918_v6 }
 0xed6   :  { %v1467_v10 = vmul.f32 -1.442695, %v891_v7 }
 0xed7   :  { %v920_v11 = vsel %vm1707_vm3, %v919_v8, %v918_v6 }
 0xed8   :  { %1592 = vpow2.f32 %v1467_v10  ;;  %v1469_v13 = vmul.f32 -1.442695, %v920_v11 }
 0xeda   :  { %1594 = vpow2.f32 %v1469_v13 }
 0xee5   :  { %v1593_v27 = vpop.eup %1592 }
 0xee6   :  { %v895_v54 = vadd.f32 1.0, %v1593_v27 }
 0xee7   :  { %v1595_v56 = vpop.eup %1594 }
 0xee8   :  { %1596 = vrcp.f32 %v895_v54  ;;  %v924_v57 = vadd.f32 1.0, %v1595_v56 }
 0xeea   :  { %1598 = vrcp.f32 %v924_v57 }
 0xef5   :  { %v1597_v14 = vpop.eup %1596 }
 0xef6   :  { %v898_v15 = vadd.f32 %v1597_v14, %v1597_v14 }
 0xef7   :  { %v1599_v16 = vpop.eup %1598 }
 0xef8   :  { %v1468_v18 = vadd.f32 -1.0, %v898_v15  ;;  %v927_v19 = vadd.f32 %v1599_v16, %v1599_v16 }
 0xefa   :  { %v900_v21 = vsel %vm1707_vm3, %v1468_v18, %v1597_v14  ;;  %v1470_v22 = vadd.f32 -1.0, %v927_v19 }
 0xefb   :  { %903 = vrot.lane.b32.xlu0 %v900_v21, %s1635_s1  ;;  %v901_v45 = vmul.f32 %v900_v21, %v2054_v52 }
 0xefc   :  { %v929_v23 = vsel %vm1707_vm3, %v1470_v22, %v1599_v16 }
 0xefd   :  { %932 = vrot.lane.b32.xlu1 %v929_v23, %s1635_s1  ;;  %v930_v53 = vmul.f32 %v929_v23, %v2058_v60 }
 0xf6d   :  { %v904_v24 = vpop.permute.xlu0 %903 }
 0xf6e   :  { %v906_v25 = vmul.f32 %v904_v24, %v900_v21 }
 0xf6f   :  { %v933_v26 = vpop.permute.xlu1 %932 }
 0xf70   :  { %v935_v38 = vmul.f32 %v933_v26, %v929_v23  ;;  %908 = vrot.lane.b32.xlu0 %v906_v25, %s1636_s15  ;;  %v1634_v25 = vld [vmem:[%s2209_s2] ss:$0 sm:$0xff] }
 0xf71   :  { %v177_v26 = vadd.f32 %v1634_v25, %v1943_v58  ;;  %v1342_v25 = vld [vmem:[%s2212_s5] sm:$0xff] }
 0xf72   :  { %937 = vrot.lane.b32.xlu1 %v935_v38, %s1636_s15 }
 0xfe2   :  { %v909_v47 = vpop.permute.xlu0 %908 }
 0xfe3   :  { %v2100_v48 = vadd.f32 %v909_v47, %v901_v45 }
 0xfe4   :  { %v938_v55 = vpop.permute.xlu1 %937 }
 0xfe5   :  { %1600 = vtanh.f32 %v2100_v48  ;;  %v2104_v20 = vadd.f32 %v938_v55, %v930_v53 }
 0xfe7   :  { %1602 = vtanh.f32 %v2104_v20 }
 0xff2   :  { %v1601_v46 = vpop.eup %1600 }
 0xff3   :  { %914 = vrot.lane.b32.xlu0 %v1601_v46, %s1635_s1 }
 0xff4   :  { %v1603_v61 = vpop.eup %1602 }
 0xff5   :  { %943 = vrot.lane.b32.xlu1 %v1603_v61, %s1635_s1 }
0x1065   :  { %v915_v50 = vpop.permute.xlu0 %914 }
0x1066   :  { %v917_v52 = vmul.f32 %v915_v50, %v900_v21 }
0x1067   :  { %v944_v62 = vpop.permute.xlu1 %943 }
0x1068   :  { %v946_v49 = vmul.f32 %v944_v62, %v929_v23  ;;  %949 = vrot.lane.b32.xlu0 %v917_v52, %s1636_s15 }
0x106a   :  { %953 = vrot.lane.b32.xlu1 %v946_v49, %s1635_s1 }
0x10da   :  { %v950_v60 = vpop.permute.xlu0 %949 }
0x10dc   :  { %v954_v17 = vpop.permute.xlu1 %953 }
0x10dd   :  { %v956_v63 = vsel %vm50_vm0, %v950_v60, %v954_v17 }
0x10de   :  { %1471 = vmatmul.mubr.msk.f32.vlgmr.msra.gmra.mxu0 %vm240_vm4, %v956_v63 }
0x10df   :  { %1260 = vmatpush1.msra.mxu0 %v1733_v28  ;;  %1307 = vmatprep.mubr.f32.mxu0 %v1637_v44  ;;  %v172_v28 = vadd.f32 %v1704_v9, %v1945_v59 }
0x10e0   :  { %1261 = vmatprep.subr.mxu0 %v1738_v29 }
0x10e1   :  { %1262 = vmatpush1.msra.mxu0 %v1744_v30 }
0x10e2   :  { %1263 = vmatprep.subr.mxu0 %v1751_v31 }
0x10e3   :  { %1264 = vmatpush1.msra.mxu0 %v1758_v32 }
0x10e4   :  { %1265 = vmatprep.subr.mxu0 %v1765_v33 }
0x10e5   :  { %1266 = vmatpush1.msra.mxu0 %v1772_v34 }
0x10e6   :  { %1267 = vmatprep.subr.mxu0 %v1779_v35 }
0x10e7   :  { %1268 = vmatpush1.msra.mxu0 %v1786_v36 }
0x10e8   :  { %1269 = vmatprep.subr.mxu0 %v1793_v37 }
0x10e9   :  { %1270 = vmatpush1.msra.mxu0 %v1800_v39 }
0x10ea   :  { %1271 = vmatprep.subr.mxu0 %v1808_v40 }
0x10eb   :  { %1272 = vmatpush1.msra.mxu0 %v1814_v41 }
0x10ec   :  { %1273 = vmatprep.subr.mxu0 %v1821_v42 }
0x10ed   :  { %1274 = vmatpush1.msra.mxu0 %v1834_v43 }
0x119e   :  { %v1026_v29 = vpop.f32.mrf.mxu0 }
0x119f   :  { %v1031_v30 = vadd.f32 %v1026_v29, %v172_v28 }
0x11a0   :  { %v1028_v31 = vpop.f32.mrf.mxu0 }
0x11a1   :  { %v1032_v32 = vadd.f32 %v1031_v30, %v1031_v30  ;;  %v1060_v33 = vadd.f32 %v1867_v51, %v1028_v31 }
0x11a3   :  { %v1033_v34 = vsel %vm1707_vm3, %v1032_v32, %v1031_v30  ;;  %v1061_v35 = vadd.f32 %v1060_v33, %v1060_v33 }
0x11a4   :  { %v1472_v36 = vmul.f32 -1.442695, %v1033_v34 }
0x11a5   :  { %v1062_v37 = vsel %vm1707_vm3, %v1061_v35, %v1060_v33 }
0x11a6   :  { %1604 = vpow2.f32 %v1472_v36  ;;  %v1474_v39 = vmul.f32 -1.442695, %v1062_v37 }
0x11a8   :  { %1606 = vpow2.f32 %v1474_v39 }
0x11b3   :  { %v1605_v40 = vpop.eup %1604 }
0x11b4   :  { %v1037_v41 = vadd.f32 1.0, %v1605_v40 }
0x11b5   :  { %v1607_v9 = vpop.eup %1606 }
0x11b6   :  { %1608 = vrcp.f32 %v1037_v41  ;;  %v1066_v42 = vadd.f32 1.0, %v1607_v9 }
0x11b8   :  { %1610 = vrcp.f32 %v1066_v42 }
0x11c3   :  { %v1609_v43 = vpop.eup %1608 }
0x11c4   :  { %v1040_v59 = vadd.f32 %v1609_v43, %v1609_v43 }
0x11c5   :  { %v1611_v0 = vpop.eup %1610 }
0x11c6   :  { %v1473_v1 = vadd.f32 -1.0, %v1040_v59  ;;  %v1069_v2 = vadd.f32 %v1611_v0, %v1611_v0 }
0x11c8   :  { %v1042_v3 = vsel %vm1707_vm3, %v1473_v1, %v1609_v43  ;;  %v1475_v4 = vadd.f32 -1.0, %v1069_v2 }
0x11c9   :  { %1045 = vrot.lane.b32.xlu0 %v1042_v3, %s1635_s1  ;;  %v1043_v11 = vmul.f32 %v1042_v3, %v2100_v48 }
0x11ca   :  { %v1071_v5 = vsel %vm1707_vm3, %v1475_v4, %v1611_v0 }
0x11cb   :  { %1074 = vrot.lane.b32.xlu1 %v1071_v5, %s1635_s1  ;;  %v1072_v54 = vmul.f32 %v1071_v5, %v2104_v20 }
0x123b   :  { %v1046_v6 = vpop.permute.xlu0 %1045 }
0x123c   :  { %v1048_v7 = vmul.f32 %v1046_v6, %v1042_v3 }
0x123d   :  { %v1075_v8 = vpop.permute.xlu1 %1074 }
0x123e   :  { %v1077_v10 = vmul.f32 %v1075_v8, %v1071_v5  ;;  %1050 = vrot.lane.b32.xlu0 %v1048_v7, %s1636_s15 }
0x1240   :  { %1079 = vrot.lane.b32.xlu1 %v1077_v10, %s1636_s15 }
0x12b0   :  { %v1051_v13 = vpop.permute.xlu0 %1050 }
0x12b1   :  { %v1053_v27 = vadd.f32 %v1051_v13, %v1043_v11 }
0x12b2   :  { %v1080_v56 = vpop.permute.xlu1 %1079 }
0x12b3   :  { %1612 = vtanh.f32 %v1053_v27  ;;  %v1082_v57 = vadd.f32 %v1080_v56, %v1072_v54 }
0x12b5   :  { %1614 = vtanh.f32 %v1082_v57 }
0x12c0   :  { %v1613_v14 = vpop.eup %1612 }
0x12c1   :  { %1056 = vrot.lane.b32.xlu0 %v1613_v14, %s1635_s1 }
0x12c2   :  { %v1615_v15 = vpop.eup %1614 }
0x12c3   :  { %1085 = vrot.lane.b32.xlu1 %v1615_v15, %s1635_s1 }
0x1333   :  { %v1057_v16 = vpop.permute.xlu0 %1056 }
0x1334   :  { %v1059_v18 = vmul.f32 %v1057_v16, %v1042_v3 }
0x1335   :  { %v1086_v19 = vpop.permute.xlu1 %1085 }
0x1336   :  { %v1088_v21 = vmul.f32 %v1086_v19, %v1071_v5  ;;  %1091 = vrot.lane.b32.xlu0 %v1059_v18, %s1636_s15 }
0x1338   :  { %1095 = vrot.lane.b32.xlu1 %v1088_v21, %s1635_s1 }
0x13a8   :  { %v1092_v22 = vpop.permute.xlu0 %1091 }
0x13aa   :  { %v1096_v23 = vpop.permute.xlu1 %1095 }
0x13ab   :  { %v1098_v24 = vsel %vm50_vm0, %v1092_v22, %v1096_v23  ;;  %v1345_v23 = vld [vmem:[%s2212_s5 + $0x18] sm:$0xff] }
0x13ac   :  { %1476 = vmatmul.mubr.msk.f32.vlgmr.msra.gmra.mxu1 %vm240_vm4, %v1098_v24  ;;  %v1344_v24 = vld [vmem:[%s2212_s5 + $0x10] sm:$0xff] }
0x13ad   :  { %1531 = vmatprep.mubr.msk.f32.mxu1 %vm1638_vm5, %v1637_v44  ;;  %1524 = vmatpush3.msra.mxu1 %v1345_v23 }
0x13ae   :  { %1525 = vmatprep.subr.mxu1 %v1637_v44 }
0x13af   :  { %1526 = vmatpush3.msra.mxu1 %v1344_v24 }
0x13b0   :  { %1527 = vmatprep.subr.mxu1 %v1637_v44 }
0x13b1   :  { %1528 = vmatpush3.msra.mxu1 %v1343_v12 }
0x13b2   :  { %1529 = vmatprep.subr.mxu1 %v1637_v44 }
0x13b3   :  { %1530 = vmatpush3.msra.mxu1 %v1342_v25 }
0x146c   :  { %v1168_v38 = vpop.f32.mrf.mxu1 }
0x146d   :  { %v1173_v45 = vadd.f32 %v1168_v38, %v177_v26 }
0x146e   :  { %v1170_v47 = vpop.f32.mrf.mxu1 }
0x146f   :  { %v1174_v48 = vadd.f32 %v1173_v45, %v1173_v45  ;;  %v1202_v53 = vadd.f32 %v1867_v51, %v1170_v47 }
0x1471   :  { %v1175_v55 = vsel %vm1707_vm3, %v1174_v48, %v1173_v45  ;;  %v1203_v20 = vadd.f32 %v1202_v53, %v1202_v53  ;;  %v1484_v48 = vld [vmem:[%s2213_s6] ss:$0 sm:$0xff] }
0x1472   :  { %v1477_v46 = vmul.f32 -1.442695, %v1175_v55 }
0x1473   :  { %v1204_v61 = vsel %vm1707_vm3, %v1203_v20, %v1202_v53 }
0x1474   :  { %1616 = vpow2.f32 %v1477_v46  ;;  %v1479_v50 = vmul.f32 -1.442695, %v1204_v61 }
0x1476   :  { %1618 = vpow2.f32 %v1479_v50 }
0x1481   :  { %v1617_v52 = vpop.eup %1616 }
0x1482   :  { %v1179_v62 = vadd.f32 1.0, %v1617_v52 }
0x1483   :  { %v1619_v58 = vpop.eup %1618 }
0x1484   :  { %1620 = vrcp.f32 %v1179_v62  ;;  %v1208_v49 = vadd.f32 1.0, %v1619_v58 }
0x1486   :  { %1622 = vrcp.f32 %v1208_v49 }
0x1491   :  { %v1621_v60 = vpop.eup %1620 }
0x1492   :  { %v1182_v17 = vadd.f32 %v1621_v60, %v1621_v60 }
0x1493   :  { %v1623_v63 = vpop.eup %1622 }
0x1494   :  { %v1478_v28 = vadd.f32 -1.0, %v1182_v17  ;;  %v1211_v29 = vadd.f32 %v1623_v63, %v1623_v63 }
0x1496   :  { %v1184_v30 = vsel %vm1707_vm3, %v1478_v28, %v1621_v60  ;;  %v1480_v31 = vadd.f32 -1.0, %v1211_v29 }
0x1497   :  { %1187 = vrot.lane.b32.xlu0 %v1184_v30, %s1635_s1  ;;  %v1185_v37 = vmul.f32 %v1184_v30, %v1053_v27 }
0x1498   :  { %v1213_v32 = vsel %vm1707_vm3, %v1480_v31, %v1623_v63 }
0x1499   :  { %1216 = vrot.lane.b32.xlu1 %v1213_v32, %s1635_s1  ;;  %v1214_v41 = vmul.f32 %v1213_v32, %v1082_v57 }
0x1509   :  { %v1188_v33 = vpop.permute.xlu0 %1187 }
0x150a   :  { %v1190_v34 = vmul.f32 %v1188_v33, %v1184_v30 }
0x150b   :  { %v1217_v35 = vpop.permute.xlu1 %1216 }
0x150c   :  { %v1219_v36 = vmul.f32 %v1217_v35, %v1213_v32  ;;  %1192 = vrot.lane.b32.xlu0 %v1190_v34, %s1636_s15 }
0x150e   :  { %1221 = vrot.lane.b32.xlu1 %v1219_v36, %s1636_s15 }
0x157e   :  { %v1193_v39 = vpop.permute.xlu0 %1192 }
0x157f   :  { %v1195_v40 = vadd.f32 %v1193_v39, %v1185_v37 }
0x1580   :  { %v1222_v9 = vpop.permute.xlu1 %1221 }
0x1581   :  { %1624 = vtanh.f32 %v1195_v40  ;;  %v1224_v42 = vadd.f32 %v1222_v9, %v1214_v41 }
0x1583   :  { %1626 = vtanh.f32 %v1224_v42 }
0x158e   :  { %v1625_v43 = vpop.eup %1624 }
0x158f   :  { %1198 = vrot.lane.b32.xlu0 %v1625_v43, %s1635_s1 }
0x1590   :  { %v1627_v59 = vpop.eup %1626 }
0x1591   :  { %1227 = vrot.lane.b32.xlu1 %v1627_v59, %s1635_s1 }
0x1601   :  { %v1199_v0 = vpop.permute.xlu0 %1198 }
0x1602   :  { %v1201_v1 = vmul.f32 %v1199_v0, %v1184_v30 }
0x1603   :  { %v1228_v2 = vpop.permute.xlu1 %1227 }
0x1604   :  { %v1230_v3 = vmul.f32 %v1228_v2, %v1213_v32  ;;  %1232 = vrot.lane.b32.xlu0 %v1201_v1, %s1636_s15 }
0x1606   :  { %1236 = vrot.lane.b32.xlu1 %v1230_v3, %s1635_s1 }
0x1676   :  { %v1233_v4 = vpop.permute.xlu0 %1232 }
0x1678   :  { %v1237_v5 = vpop.permute.xlu1 %1236 }
0x1679   :  { %v1239_v6 = vsel %vm50_vm0, %v1233_v4, %v1237_v5 }
0x167a   :  { %1481 = vmatmul.mubr.msk.f32.vlgmr.msra.gmra.mxu0 %vm240_vm4, %v1239_v6 }
0x173a   :  { %v1309_v7 = vpop.f32.mrf.mxu0 }
0x173c   :  { %v1310_v8 = vpop.f32.mrf.mxu0 }
0x173d   :  { %v1313_v10 = vadd.f32 %v1867_v51, %v1310_v8 }
0x173f   :  { %v1314_v11 = vadd.f32 %v1313_v10, %v1313_v10 }
0x1741   :  { %v1315_v13 = vsel %vm1707_vm3, %v1314_v11, %v1313_v10 }
0x1742   :  { %v1482_v27 = vmul.f32 -1.442695, %v1315_v13 }
0x1744   :  { %1628 = vpow2.f32 %v1482_v27 }
0x1751   :  { %v1629_v54 = vpop.eup %1628 }
0x1752   :  { %v1319_v56 = vadd.f32 1.0, %v1629_v54 }
0x1754   :  { %1630 = vrcp.f32 %v1319_v56 }
0x1761   :  { %v1631_v57 = vpop.eup %1630 }
0x1762   :  { %v1322_v14 = vadd.f32 %v1631_v57, %v1631_v57 }
0x1764   :  { %v1483_v15 = vadd.f32 -1.0, %v1322_v14 }
0x1766   :  { %v1324_v16 = vsel %vm1707_vm3, %v1483_v15, %v1631_v57 }
0x1767   :  { %1327 = vrot.lane.b32.xlu0 %v1324_v16, %s1635_s1  ;;  %v1325_v51 = vmul.f32 %v1324_v16, %v1224_v42 }
0x17d9   :  { %v1328_v18 = vpop.permute.xlu0 %1327 }
0x17da   :  { %v1330_v19 = vmul.f32 %v1328_v18, %v1324_v16 }
0x17dc   :  { %1332 = vrot.lane.b32.xlu1 %v1330_v19, %s1636_s15 }
0x184e   :  { %v1333_v21 = vpop.permute.xlu1 %1332 }
0x184f   :  { %v1335_v22 = vadd.f32 %v1333_v21, %v1325_v51 }
0x1851   :  { %1632 = vtanh.f32 %v1335_v22 }
0x185e   :  { %v1633_v26 = vpop.eup %1632 }
0x185f   :  { %1338 = vrot.lane.b32.xlu0 %v1633_v26, %s1635_s1 }
0x18d1   :  { %v1339_v38 = vpop.permute.xlu0 %1338 }
0x18d2   :  { %v1341_v45 = vmul.f32 %v1339_v38, %v1324_v16 }
0x18d4   :  { %1354 = vrot.lane.b32.xlu1 %v1341_v45, %s1636_s15 }
0x1946   :  { %v1355_v47 = vpop.permute.xlu1 %1354 }
0x1947   :  { %1532 = vmatmul.mubr.msk.f32.vlgmr.msra.gmra.mxu1 %vm50_vm0, %v1355_v47 }
0x1a07   :  { %v1424_v53 = vpop.f32.mrf.mxu1 }
0x1a08   :  { %v1425_v55 = vadd.f32 %v1484_v48, %v1424_v53 }
0x1a09   :  { %v1533_v20 = vpop.f32.mrf.mxu1 }
0x1a0a   :  { %1429 = vst.msk [vmem:[%s2214_s7] sm:$0xff] %vm1428_vm6, %v1425_v55 }

</bundles_post_ra>
